<compile_context>
chip_gen: v7x
topology: tpu7x:2x2x1
jax: 0.10.0
libtpu: 0.0.40
codegen_flags: <defaults>
</compile_context>

<pallas_src>
import jax
import jax.numpy as jnp
import numpy as np
from jax.experimental import pallas as pl
from jax.experimental.pallas import tpu as pltpu

D = 128        # d (groups)
H = 1024       # h (encoder output channels)
U = 32         # u (out channels per group of conv1)
KPG = H // D   # 8  (in channels per group of conv1)
F_IN = 256     # synthetic encoder input feature size
B = 2          # batch per view (small example shape)


def _round_up(x, m):
    return ((x + m - 1) // m) * m


# ----------------------------- fused kernel -------------------------------- #

def neuralfp_kernel(x_ref, wep_ref, bep_ref, w1_ref, b1_ref, w2_ref, b2_ref,
                    hp_ref, z_ref):
    n = x_ref.shape[0]

    # --- encoder, computed directly in grouped layout: hp[:, k*D+g] == h[:, g*KPG+k]
    #     (single bf16 MXU matmul, f32 accumulation; weights are permuted once at setup time)
    hp = jnp.dot(x_ref[...], wep_ref[...],
                 preferred_element_type=jnp.float32) + bep_ref[...]
    hp = jnp.maximum(hp, 0.0)
    hp_ref[...] = hp

    # --- grouped conv1 (Conv1d(H, D*U, 1, groups=D)):
    #     y[b, o, g] = sum_k hp[b, k*D+g] * w1t[k, o, g] + b1t[o, g]
    # Unrolled KPG-loop keeps only a (n, U, D) accumulator live; every hp slice is a free,
    # lane-aligned 128-wide static slice (no cross-lane shuffles).
    y = jnp.zeros((n, U, D), dtype=jnp.float32)
    for k in range(KPG):
        hk = hp[:, k * D:(k + 1) * D]                     # (n, D)
        y = y + hk[:, None, :] * w1_ref[k][None, :, :]
    y = y + b1_ref[...][None]

    # ELU(alpha=1)
    y = jnp.where(y > 0.0, y, jnp.exp(y) - 1.0)

    # --- grouped conv2 (Conv1d(D*U, D, 1, groups=D)):
    #     z[b, g] = sum_o y[b, o, g] * w2t[o, g] + b2t[g]
    z = jnp.sum(y * w2_ref[...][None], axis=1) + b2_ref[...]       # (n, D)

    # --- F.normalize(z, p=2, dim=1): z / max(||z||, 1e-12)   (rsqrt -> EUP)
    ss = jnp.sum(z * z, axis=-1, keepdims=True)
    z_ref[...] = z * jax.lax.rsqrt(jnp.maximum(ss, 1e-24))


# ----------------------------- wrapper -------------------------------------- #

def make_params(w_enc, b_enc, w1, b1, w2, b2):
    # One-time host-side re-layouts: fold the "regroup" permutation into the encoder weights
    # so the kernel produces hp (grouped layout) directly.  wep[:, k*D+g] = w_enc[:, g*KPG+k].
    wep = jnp.transpose(w_enc.reshape(F_IN, D, KPG), (0, 2, 1)).reshape(F_IN, H)
    bep = jnp.transpose(b_enc.reshape(1, D, KPG), (0, 2, 1)).reshape(1, H)
    return {
        "wep": wep.astype(jnp.bfloat16),                           # (F_IN, H) bf16
        "bep": bep,                                                # (1, H)    f32
        "w1t": jnp.transpose(w1.reshape(D, U, KPG), (2, 1, 0)),    # (KPG, U, D): w1t[k,o,g]=w1[g*U+o,k]
        "b1t": jnp.transpose(b1.reshape(D, U), (1, 0)),            # (U, D)
        "w2t": jnp.transpose(w2, (1, 0)),                          # (U, D)
        "b2t": b2.reshape(1, D),                                   # (1, D)
    }


@jax.jit
def neuralfp_forward(x_i, x_j, params):
    b = x_i.shape[0]
    # One launch for both views; pre-cast to bf16 in the wrapper (no in-kernel relayout).
    x = jnp.concatenate([x_i, x_j], axis=0).astype(jnp.bfloat16)   # (2B, F_IN)
    n = x.shape[0]

    # Row tiling: up to 128 rows per grid step; weights stay VMEM-resident across steps.
    tm = 128 if n >= 128 else _round_up(n, 8)
    n_pad = _round_up(n, tm)
    if n_pad != n:
        x = jnp.pad(x, ((0, n_pad - n), (0, 0)))
    grid = (n_pad // tm,)

    hp, z = pl.pallas_call(
        neuralfp_kernel,
        out_shape=(jax.ShapeDtypeStruct((n_pad, H), jnp.float32),
                   jax.ShapeDtypeStruct((n_pad, D), jnp.float32)),
        grid=grid,
        in_specs=[
            pl.BlockSpec((tm, F_IN), lambda i: (i, 0)),       # x (bf16)  -- tiled over rows
            pl.BlockSpec((F_IN, H), lambda i: (0, 0)),        # wep (bf16) -- resident
            pl.BlockSpec((1, H), lambda i: (0, 0)),           # bep
            pl.BlockSpec((KPG, U, D), lambda i: (0, 0, 0)),   # w1t
            pl.BlockSpec((U, D), lambda i: (0, 0)),           # b1t
            pl.BlockSpec((U, D), lambda i: (0, 0)),           # w2t
            pl.BlockSpec((1, D), lambda i: (0, 0)),           # b2t
        ],
        out_specs=(pl.BlockSpec((tm, H), lambda i: (i, 0)),
                   pl.BlockSpec((tm, D), lambda i: (i, 0))),
        compiler_params=pltpu.CompilerParams(
            dimension_semantics=("parallel",)),                # megacore shards rows on v7x
    )(x, params["wep"], params["bep"],
      params["w1t"], params["b1t"], params["w2t"], params["b2t"])

    # Recover natural channel order (tiny (n,1024) permute at the XLA level, per review):
    # h[:, g*KPG+k] = hp[:, k*D+g]
    h = hp.reshape(n_pad, KPG, D).transpose(0, 2, 1).reshape(n_pad, H)
    return h[:b], h[b:n], z[:b], z[b:n]


# ----------------------------- reference (numpy, f32) ----------------------- #

def reference_forward(x, w_enc, b_enc, w1, b1, w2, b2):
    h = np.maximum(x @ w_enc + b_enc, 0.0)                          # (B, H)
    hin = h.reshape(-1, D, KPG)                                     # channel c -> (g=c//KPG, k=c%KPG)
    w1r = w1.reshape(D, U, KPG)                                     # out channel g*U+o
    y = np.einsum("bgk,gok->bgo", hin, w1r) + b1.reshape(D, U)      # (B, D, U)
    y = np.where(y > 0.0, y, np.exp(y) - 1.0)                       # ELU
    z = np.einsum("bgo,go->bg", y, w2) + b2                         # (B, D)
    z = z / np.maximum(np.linalg.norm(z, axis=1, keepdims=True), 1e-12)
    return h, z


# ----------------------------- main ----------------------------------------- #

if __name__ == "__main__":
    key = jax.random.PRNGKey(0)
    k_xi, k_xj, k_we, k_be, k_w1, k_b1, k_w2, k_b2 = jax.random.split(key, 8)

    x_i = jax.random.normal(k_xi, (B, F_IN), dtype=jnp.float32)
    x_j = jax.random.normal(k_xj, (B, F_IN), dtype=jnp.float32)

    # deterministic synthetic parameters (PyTorch-conv-shaped, kernel_size=1 squeezed)
    w_enc = jax.random.normal(k_we, (F_IN, H), dtype=jnp.float32) / np.sqrt(F_IN)
    b_enc = 0.01 * jax.random.normal(k_be, (1, H), dtype=jnp.float32)
    w1 = jax.random.normal(k_w1, (D * U, KPG), dtype=jnp.float32) / np.sqrt(KPG)   # Conv1d(H, D*U, 1, groups=D).weight
    b1 = 0.01 * jax.random.normal(k_b1, (D * U,), dtype=jnp.float32)
    w2 = jax.random.normal(k_w2, (D, U), dtype=jnp.float32) / np.sqrt(U)           # Conv1d(D*U, D, 1, groups=D).weight
    b2 = 0.01 * jax.random.normal(k_b2, (D,), dtype=jnp.float32)

    params = make_params(w_enc, b_enc, w1, b1, w2, b2)

    h_i, h_j, z_i, z_j = jax.block_until_ready(neuralfp_forward(x_i, x_j, params))

    # numerical sanity check vs. f32 numpy reference (tolerance covers bf16 encoder weights/x)
    h_i_ref, z_i_ref = reference_forward(np.asarray(x_i), np.asarray(w_enc), np.asarray(b_enc),
                                         np.asarray(w1), np.asarray(b1), np.asarray(w2), np.asarray(b2))
    h_j_ref, z_j_ref = reference_forward(np.asarray(x_j), np.asarray(w_enc), np.asarray(b_enc),
                                         np.asarray(w1), np.asarray(b1), np.asarray(w2), np.asarray(b2))
    assert np.allclose(np.asarray(h_i), h_i_ref, rtol=2e-2, atol=2e-2)
    assert np.allclose(np.asarray(h_j), h_j_ref, rtol=2e-2, atol=2e-2)
    assert np.allclose(np.asarray(z_i), z_i_ref, rtol=2e-2, atol=2e-2)
    assert np.allclose(np.asarray(z_j), z_j_ref, rtol=2e-2, atol=2e-2)
    assert h_i.shape == (B, H) and z_i.shape == (B, D)

    print("KERNEL_OK")
</pallas_src>

<mosaic_0001>
module attributes {stable_mosaic.version = 11 : i64} {
  func.func @neuralfp_kernel(%arg0: i32, %arg1: memref<8x256xbf16, #tpu.memory_space<vmem>>, %arg2: memref<256x1024xbf16, #tpu.memory_space<vmem>>, %arg3: memref<1x1024xf32, #tpu.memory_space<vmem>>, %arg4: memref<8x32x128xf32, #tpu.memory_space<vmem>>, %arg5: memref<32x128xf32, #tpu.memory_space<vmem>>, %arg6: memref<32x128xf32, #tpu.memory_space<vmem>>, %arg7: memref<1x128xf32, #tpu.memory_space<vmem>>, %arg8: memref<8x1024xf32, #tpu.memory_space<vmem>>, %arg9: memref<8x128xf32, #tpu.memory_space<vmem>>) attributes {dimension_semantics = [#tpu.dimension_semantics<parallel>], iteration_bounds = array<i64: 1>, scalar_prefetch = 0 : i64, scratch_operands = 0 : i64, tpu.core_type = #tpu.core_type<tc>, window_params = [{transform_indices = @transform_0, window_bounds = array<i64: 8, 256>}, {pipeline_mode = #tpu.pipeline_mode<synchronous>, transform_indices = @transform_1, window_bounds = array<i64: 256, 1024>}, {pipeline_mode = #tpu.pipeline_mode<synchronous>, transform_indices = @transform_2, window_bounds = array<i64: 1, 1024>}, {pipeline_mode = #tpu.pipeline_mode<synchronous>, transform_indices = @transform_3, window_bounds = array<i64: 8, 32, 128>}, {pipeline_mode = #tpu.pipeline_mode<synchronous>, transform_indices = @transform_4, window_bounds = array<i64: 32, 128>}, {pipeline_mode = #tpu.pipeline_mode<synchronous>, transform_indices = @transform_5, window_bounds = array<i64: 32, 128>}, {pipeline_mode = #tpu.pipeline_mode<synchronous>, transform_indices = @transform_6, window_bounds = array<i64: 1, 128>}, {transform_indices = @transform_7, window_bounds = array<i64: 8, 1024>}, {transform_indices = @transform_8, window_bounds = array<i64: 8, 128>}]} {
    %c0 = arith.constant 0 : index
    %c0_0 = arith.constant 0 : index
    %0 = vector.load %arg1[%c0, %c0_0] : memref<8x256xbf16, #tpu.memory_space<vmem>>, vector<8x256xbf16>
    %c0_1 = arith.constant 0 : index
    %c0_2 = arith.constant 0 : index
    %1 = vector.load %arg2[%c0_1, %c0_2] : memref<256x1024xbf16, #tpu.memory_space<vmem>>, vector<256x1024xbf16>
    %cst = arith.constant dense<0.000000e+00> : vector<8x1024xf32>
    %2 = tpu.matmul %0, %1, %cst {dimension_numbers = #tpu.dot_dimension_numbers<[1], [0], [0], [1], [0, 0, 1, 1], [], []>} : vector<8x256xbf16>, vector<256x1024xbf16>, vector<8x1024xf32> -> vector<8x1024xf32>
    %c0_3 = arith.constant 0 : index
    %c0_4 = arith.constant 0 : index
    %3 = vector.load %arg3[%c0_3, %c0_4] : memref<1x1024xf32, #tpu.memory_space<vmem>>, vector<1x1024xf32>
    %4 = vector.broadcast %3 : vector<1x1024xf32> to vector<8x1024xf32>
    %5 = arith.addf %2, %4 : vector<8x1024xf32>
    %cst_5 = arith.constant 0.000000e+00 : f32
    %6 = vector.broadcast %cst_5 : f32 to vector<8x1024xf32>
    %7 = arith.maximumf %5, %6 : vector<8x1024xf32>
    %c0_6 = arith.constant 0 : index
    %c0_7 = arith.constant 0 : index
    %8 = vector.load %arg8[%c0_6, %c0_7] : memref<8x1024xf32, #tpu.memory_space<vmem>>, vector<8x1024xf32>
    tpu.vector_store %arg8[%c0_6, %c0_7], %7 {strides = array<i32>} : memref<8x1024xf32, #tpu.memory_space<vmem>>, vector<8x1024xf32>,
    %cst_8 = arith.constant 0.000000e+00 : f32
    %9 = vector.broadcast %cst_8 : f32 to vector<8x32x128xf32>
    %10 = vector.extract_strided_slice %7 {offsets = [0, 0], sizes = [8, 128], strides = [1, 1]} : vector<8x1024xf32> to vector<8x128xf32>
    %11 = vector.shape_cast %10 : vector<8x128xf32> to vector<8x1x128xf32>
    %c0_9 = arith.constant 0 : index
    %c0_10 = arith.constant 0 : index
    %c0_11 = arith.constant 0 : index
    %12 = vector.load %arg4[%c0_9, %c0_10, %c0_11] : memref<8x32x128xf32, #tpu.memory_space<vmem>>, vector<1x32x128xf32>
    %13 = vector.shape_cast %12 : vector<1x32x128xf32> to vector<32x128xf32>
    %14 = vector.shape_cast %13 : vector<32x128xf32> to vector<1x32x128xf32>
    %15 = vector.broadcast %11 : vector<8x1x128xf32> to vector<8x32x128xf32>
    %16 = vector.broadcast %14 : vector<1x32x128xf32> to vector<8x32x128xf32>
    %17 = arith.mulf %15, %16 : vector<8x32x128xf32>
    %18 = arith.addf %9, %17 : vector<8x32x128xf32>
    %19 = vector.extract_strided_slice %7 {offsets = [0, 128], sizes = [8, 128], strides = [1, 1]} : vector<8x1024xf32> to vector<8x128xf32>
    %20 = vector.shape_cast %19 : vector<8x128xf32> to vector<8x1x128xf32>
    %c1 = arith.constant 1 : index
    %c0_12 = arith.constant 0 : index
    %c0_13 = arith.constant 0 : index
    %21 = vector.load %arg4[%c1, %c0_12, %c0_13] : memref<8x32x128xf32, #tpu.memory_space<vmem>>, vector<1x32x128xf32>
    %22 = vector.shape_cast %21 : vector<1x32x128xf32> to vector<32x128xf32>
    %23 = vector.shape_cast %22 : vector<32x128xf32> to vector<1x32x128xf32>
    %24 = vector.broadcast %20 : vector<8x1x128xf32> to vector<8x32x128xf32>
    %25 = vector.broadcast %23 : vector<1x32x128xf32> to vector<8x32x128xf32>
    %26 = arith.mulf %24, %25 : vector<8x32x128xf32>
    %27 = arith.addf %18, %26 : vector<8x32x128xf32>
    %28 = vector.extract_strided_slice %7 {offsets = [0, 256], sizes = [8, 128], strides = [1, 1]} : vector<8x1024xf32> to vector<8x128xf32>
    %29 = vector.shape_cast %28 : vector<8x128xf32> to vector<8x1x128xf32>
    %c2 = arith.constant 2 : index
    %c0_14 = arith.constant 0 : index
    %c0_15 = arith.constant 0 : index
    %30 = vector.load %arg4[%c2, %c0_14, %c0_15] : memref<8x32x128xf32, #tpu.memory_space<vmem>>, vector<1x32x128xf32>
    %31 = vector.shape_cast %30 : vector<1x32x128xf32> to vector<32x128xf32>
    %32 = vector.shape_cast %31 : vector<32x128xf32> to vector<1x32x128xf32>
    %33 = vector.broadcast %29 : vector<8x1x128xf32> to vector<8x32x128xf32>
    %34 = vector.broadcast %32 : vector<1x32x128xf32> to vector<8x32x128xf32>
    %35 = arith.mulf %33, %34 : vector<8x32x128xf32>
    %36 = arith.addf %27, %35 : vector<8x32x128xf32>
    %37 = vector.extract_strided_slice %7 {offsets = [0, 384], sizes = [8, 128], strides = [1, 1]} : vector<8x1024xf32> to vector<8x128xf32>
    %38 = vector.shape_cast %37 : vector<8x128xf32> to vector<8x1x128xf32>
    %c3 = arith.constant 3 : index
    %c0_16 = arith.constant 0 : index
    %c0_17 = arith.constant 0 : index
    %39 = vector.load %arg4[%c3, %c0_16, %c0_17] : memref<8x32x128xf32, #tpu.memory_space<vmem>>, vector<1x32x128xf32>
    %40 = vector.shape_cast %39 : vector<1x32x128xf32> to vector<32x128xf32>
    %41 = vector.shape_cast %40 : vector<32x128xf32> to vector<1x32x128xf32>
    %42 = vector.broadcast %38 : vector<8x1x128xf32> to vector<8x32x128xf32>
    %43 = vector.broadcast %41 : vector<1x32x128xf32> to vector<8x32x128xf32>
    %44 = arith.mulf %42, %43 : vector<8x32x128xf32>
    %45 = arith.addf %36, %44 : vector<8x32x128xf32>
    %46 = vector.extract_strided_slice %7 {offsets = [0, 512], sizes = [8, 128], strides = [1, 1]} : vector<8x1024xf32> to vector<8x128xf32>
    %47 = vector.shape_cast %46 : vector<8x128xf32> to vector<8x1x128xf32>
    %c4 = arith.constant 4 : index
    %c0_18 = arith.constant 0 : index
    %c0_19 = arith.constant 0 : index
    %48 = vector.load %arg4[%c4, %c0_18, %c0_19] : memref<8x32x128xf32, #tpu.memory_space<vmem>>, vector<1x32x128xf32>
    %49 = vector.shape_cast %48 : vector<1x32x128xf32> to vector<32x128xf32>
    %50 = vector.shape_cast %49 : vector<32x128xf32> to vector<1x32x128xf32>
    %51 = vector.broadcast %47 : vector<8x1x128xf32> to vector<8x32x128xf32>
    %52 = vector.broadcast %50 : vector<1x32x128xf32> to vector<8x32x128xf32>
    %53 = arith.mulf %51, %52 : vector<8x32x128xf32>
    %54 = arith.addf %45, %53 : vector<8x32x128xf32>
    %55 = vector.extract_strided_slice %7 {offsets = [0, 640], sizes = [8, 128], strides = [1, 1]} : vector<8x1024xf32> to vector<8x128xf32>
    %56 = vector.shape_cast %55 : vector<8x128xf32> to vector<8x1x128xf32>
    %c5 = arith.constant 5 : index
    %c0_20 = arith.constant 0 : index
    %c0_21 = arith.constant 0 : index
    %57 = vector.load %arg4[%c5, %c0_20, %c0_21] : memref<8x32x128xf32, #tpu.memory_space<vmem>>, vector<1x32x128xf32>
    %58 = vector.shape_cast %57 : vector<1x32x128xf32> to vector<32x128xf32>
    %59 = vector.shape_cast %58 : vector<32x128xf32> to vector<1x32x128xf32>
    %60 = vector.broadcast %56 : vector<8x1x128xf32> to vector<8x32x128xf32>
    %61 = vector.broadcast %59 : vector<1x32x128xf32> to vector<8x32x128xf32>
    %62 = arith.mulf %60, %61 : vector<8x32x128xf32>
    %63 = arith.addf %54, %62 : vector<8x32x128xf32>
    %64 = vector.extract_strided_slice %7 {offsets = [0, 768], sizes = [8, 128], strides = [1, 1]} : vector<8x1024xf32> to vector<8x128xf32>
    %65 = vector.shape_cast %64 : vector<8x128xf32> to vector<8x1x128xf32>
    %c6 = arith.constant 6 : index
    %c0_22 = arith.constant 0 : index
    %c0_23 = arith.constant 0 : index
    %66 = vector.load %arg4[%c6, %c0_22, %c0_23] : memref<8x32x128xf32, #tpu.memory_space<vmem>>, vector<1x32x128xf32>
    %67 = vector.shape_cast %66 : vector<1x32x128xf32> to vector<32x128xf32>
    %68 = vector.shape_cast %67 : vector<32x128xf32> to vector<1x32x128xf32>
    %69 = vector.broadcast %65 : vector<8x1x128xf32> to vector<8x32x128xf32>
    %70 = vector.broadcast %68 : vector<1x32x128xf32> to vector<8x32x128xf32>
    %71 = arith.mulf %69, %70 : vector<8x32x128xf32>
    %72 = arith.addf %63, %71 : vector<8x32x128xf32>
    %73 = vector.extract_strided_slice %7 {offsets = [0, 896], sizes = [8, 128], strides = [1, 1]} : vector<8x1024xf32> to vector<8x128xf32>
    %74 = vector.shape_cast %73 : vector<8x128xf32> to vector<8x1x128xf32>
    %c7 = arith.constant 7 : index
    %c0_24 = arith.constant 0 : index
    %c0_25 = arith.constant 0 : index
    %75 = vector.load %arg4[%c7, %c0_24, %c0_25] : memref<8x32x128xf32, #tpu.memory_space<vmem>>, vector<1x32x128xf32>
    %76 = vector.shape_cast %75 : vector<1x32x128xf32> to vector<32x128xf32>
    %77 = vector.shape_cast %76 : vector<32x128xf32> to vector<1x32x128xf32>
    %78 = vector.broadcast %74 : vector<8x1x128xf32> to vector<8x32x128xf32>
    %79 = vector.broadcast %77 : vector<1x32x128xf32> to vector<8x32x128xf32>
    %80 = arith.mulf %78, %79 : vector<8x32x128xf32>
    %81 = arith.addf %72, %80 : vector<8x32x128xf32>
    %c0_26 = arith.constant 0 : index
    %c0_27 = arith.constant 0 : index
    %82 = vector.load %arg5[%c0_26, %c0_27] : memref<32x128xf32, #tpu.memory_space<vmem>>, vector<32x128xf32>
    %83 = vector.shape_cast %82 : vector<32x128xf32> to vector<1x32x128xf32>
    %84 = vector.broadcast %83 : vector<1x32x128xf32> to vector<8x32x128xf32>
    %85 = arith.addf %81, %84 : vector<8x32x128xf32>
    %cst_28 = arith.constant 0.000000e+00 : f32
    %86 = vector.broadcast %cst_28 : f32 to vector<8x32x128xf32>
    %87 = arith.cmpf ogt, %85, %86 : vector<8x32x128xf32>
    %88 = math.exp %85 : vector<8x32x128xf32>
    %cst_29 = arith.constant 1.000000e+00 : f32
    %89 = vector.broadcast %cst_29 : f32 to vector<8x32x128xf32>
    %90 = arith.subf %88, %89 : vector<8x32x128xf32>
    %91 = arith.select %87, %85, %90 : vector<8x32x128xi1>, vector<8x32x128xf32>
    %c0_30 = arith.constant 0 : index
    %c0_31 = arith.constant 0 : index
    %92 = vector.load %arg6[%c0_30, %c0_31] : memref<32x128xf32, #tpu.memory_space<vmem>>, vector<32x128xf32>
    %93 = vector.shape_cast %92 : vector<32x128xf32> to vector<1x32x128xf32>
    %94 = vector.broadcast %93 : vector<1x32x128xf32> to vector<8x32x128xf32>
    %95 = arith.mulf %91, %94 : vector<8x32x128xf32>
    %cst_32 = arith.constant dense<0.000000e+00> : vector<8x128xf32>
    %96 = vector.multi_reduction <add>, %95, %cst_32 [1] : vector<8x32x128xf32> to vector<8x128xf32>
    %c0_33 = arith.constant 0 : index
    %c0_34 = arith.constant 0 : index
    %97 = vector.load %arg7[%c0_33, %c0_34] : memref<1x128xf32, #tpu.memory_space<vmem>>, vector<1x128xf32>
    %98 = vector.broadcast %97 : vector<1x128xf32> to vector<8x128xf32>
    %99 = arith.addf %96, %98 : vector<8x128xf32>
    %100 = arith.mulf %99, %99 : vector<8x128xf32>
    %cst_35 = arith.constant dense<0.000000e+00> : vector<8xf32>
    %101 = vector.multi_reduction <add>, %100, %cst_35 [1] : vector<8x128xf32> to vector<8xf32>
    %102 = vector.shape_cast %101 : vector<8xf32> to vector<8x1xf32>
    %cst_36 = arith.constant 1.000000e-24 : f32
    %103 = vector.broadcast %cst_36 : f32 to vector<8x1xf32>
    %104 = arith.maximumf %102, %103 : vector<8x1xf32>
    %105 = math.rsqrt %104 : vector<8x1xf32>
    %106 = vector.broadcast %105 : vector<8x1xf32> to vector<8x128xf32>
    %107 = arith.mulf %99, %106 : vector<8x128xf32>
    %c0_37 = arith.constant 0 : index
    %c0_38 = arith.constant 0 : index
    %108 = vector.load %arg9[%c0_37, %c0_38] : memref<8x128xf32, #tpu.memory_space<vmem>>, vector<8x128xf32>
    tpu.vector_store %arg9[%c0_37, %c0_38], %107 {strides = array<i32>} : memref<8x128xf32, #tpu.memory_space<vmem>>, vector<8x128xf32>,
    return
  }
  func.func @transform_0(%arg0: i32) -> (i32, i32) {
    %c0_i32 = arith.constant 0 : i32
    %c0_i32_0 = arith.constant 0 : i32
    return %arg0, %c0_i32 : i32, i32
  }
  func.func @transform_1(%arg0: i32) -> (i32, i32) {
    %c0_i32 = arith.constant 0 : i32
    %c0_i32_0 = arith.constant 0 : i32
    %c0_i32_1 = arith.constant 0 : i32
    return %c0_i32, %c0_i32_0 : i32, i32
  }
  func.func @transform_2(%arg0: i32) -> (i32, i32) {
    %c0_i32 = arith.constant 0 : i32
    %c0_i32_0 = arith.constant 0 : i32
    %c0_i32_1 = arith.constant 0 : i32
    return %c0_i32, %c0_i32_0 : i32, i32
  }
  func.func @transform_3(%arg0: i32) -> (i32, i32, i32) {
    %c0_i32 = arith.constant 0 : i32
    %c0_i32_0 = arith.constant 0 : i32
    %c0_i32_1 = arith.constant 0 : i32
    %c0_i32_2 = arith.constant 0 : i32
    return %c0_i32, %c0_i32_0, %c0_i32_1 : i32, i32, i32
  }
  func.func @transform_4(%arg0: i32) -> (i32, i32) {
    %c0_i32 = arith.constant 0 : i32
    %c0_i32_0 = arith.constant 0 : i32
    %c0_i32_1 = arith.constant 0 : i32
    return %c0_i32, %c0_i32_0 : i32, i32
  }
  func.func @transform_5(%arg0: i32) -> (i32, i32) {
    %c0_i32 = arith.constant 0 : i32
    %c0_i32_0 = arith.constant 0 : i32
    %c0_i32_1 = arith.constant 0 : i32
    return %c0_i32, %c0_i32_0 : i32, i32
  }
  func.func @transform_6(%arg0: i32) -> (i32, i32) {
    %c0_i32 = arith.constant 0 : i32
    %c0_i32_0 = arith.constant 0 : i32
    %c0_i32_1 = arith.constant 0 : i32
    return %c0_i32, %c0_i32_0 : i32, i32
  }
  func.func @transform_7(%arg0: i32) -> (i32, i32) {
    %c0_i32 = arith.constant 0 : i32
    %c0_i32_0 = arith.constant 0 : i32
    return %arg0, %c0_i32 : i32, i32
  }
  func.func @transform_8(%arg0: i32) -> (i32, i32) {
    %c0_i32 = arith.constant 0 : i32
    %c0_i32_0 = arith.constant 0 : i32
    return %arg0, %c0_i32 : i32, i32
  }
}

</mosaic_0001>

<bundles_post_ra>
// kernel: neuralfp_forward.1
= control target key start
LH: loop header
LB: loop body
LE: loop exit
PB: predicated region body
PF: predicated region fallthrough
CT: control target
= control target key end

     0   :  { %14 = vsyncpa [#allocation3], 0  ;;  %s4575_s0 = inlined_call_operand.vmem [shape: bf16[8,256], index: 0, kind: input, shape index: {}]   ;;  %s4576_s1 = inlined_call_operand.hbm [shape: bf16[256,1024], index: 1, kind: input, shape index: {}]   ;;  %s4577_s2 = inlined_call_operand.vmem [shape: f32[1,1024], index: 2, kind: input, shape index: {}]   ;;  %s4578_s3 = inlined_call_operand.hbm [shape: f32[8,32,128], index: 3, kind: input, shape index: {}]   ;;  %s4579_s4 = inlined_call_operand.vmem [shape: f32[32,128], index: 4, kind: input, shape index: {}]   ;;  %s4580_s5 = inlined_call_operand.hbm [shape: f32[32,128], index: 5, kind: input, shape index: {}]   ;;  %s4581_s6 = inlined_call_operand.vmem [shape: f32[1,128], index: 6, kind: input, shape index: {}]   ;;  %s4582_s7 = inlined_call_operand.vmem [shape: f32[8,1024], index: 7, kind: output, shape index: {0}]   ;;  %s4583_s8 = inlined_call_operand.vmem [shape: f32[8,128], index: 8, kind: output, shape index: {1}]  }
   0x1   :  { %15 = vsyncpa [#allocation5], 0  ;;  %s3066_s27 = smov [#allocation4]   ;;  %s2996_s9 = scalar_lea.hbm %s4578_s3, 4096 }
   0x2   :  { %s37_s28 = sshll.u32 %s3066_s27, 4  ;;  %p2997_p0 = scmp.ne.s32.totalorder %s4578_s3, %s2996_s9  ;;  %s38_s28 = int_to_ptr.vmem [resolvable:$true] %s37_s28 }
   0x3   :  { %p3000_p1 = scmp.lt.u32.totalorder %s2996_s9, %s4578_s3 }
   0x5   :  { %p3002_p2 = pnand %p3000_p1, %p2997_p0 }
   0x7   :  { %3005 = shalt.err (!%p3002_p2)
}
   0x8   :  { %s3006_s14 = scalar_lea.vmem %s38_s28, 4096  ;;  %p3011_p4 = scmp.lt.s32.totalorder %s38_s28, %s38_s28 }
   0x9   :  { %p3007_p3 = scmp.ne.s32.totalorder %s38_s28, %s3006_s14  ;;  %p3012_p5 = scmp.lt.s32.totalorder %s3006_s14, %s3006_s14 }
   0xb   :  { %p3013_p6 = por %p3012_p5, %p3011_p4 }
   0xd   :  { %p3014_p7 = pnand %p3013_p6, %p3007_p3 }
   0xf   :  { %3017 = shalt.err (!%p3014_p7)
}
  0x10   :  { %s3067_s15 = smov 128   ;;  %s3068_s16 = smov 8  }
  0x11   :  { %43 = dma.hbm_to_vmem [thread:$0]  %s4578_s3, 4096, %s38_s28, [#allocation5], %s3067_s15, %s3067_s15, %s3068_s16  }
  0x12   :  { %s3069_s19 = smov [#allocation2]   ;;  %s3018_s23 = scalar_lea.hbm %s4576_s1, 16384 }
  0x13   :  { %s23_s20 = sshll.u32 %s3069_s19, 4  ;;  %p3019_p8 = scmp.ne.s32.totalorder %s4576_s1, %s3018_s23  ;;  %s24_s20 = int_to_ptr.vmem [resolvable:$true] %s23_s20 }
  0x14   :  { %p3022_p9 = scmp.lt.u32.totalorder %s3018_s23, %s4576_s1 }
  0x16   :  { %p3024_p10 = pnand %p3022_p9, %p3019_p8 }
  0x18   :  { %3027 = shalt.err (!%p3024_p10)
}
  0x19   :  { %s3028_s29 = scalar_lea.vmem %s24_s20, 16384  ;;  %p3033_p12 = scmp.lt.s32.totalorder %s24_s20, %s24_s20 }
  0x1a   :  { %p3029_p11 = scmp.ne.s32.totalorder %s24_s20, %s3028_s29  ;;  %p3034_p13 = scmp.lt.s32.totalorder %s3028_s29, %s3028_s29 }
  0x1c   :  { %p3035_p0 = por %p3034_p13, %p3033_p12 }
  0x1e   :  { %p3036_p1 = pnand %p3035_p0, %p3029_p11 }
  0x20   :  { %3039 = shalt.err (!%p3036_p1)
}
  0x21   :  { %s3070_s3 = smov 512   ;;  %s3071_s28 = smov 32  }
  0x22   :  { %29 = dma.hbm_to_vmem [thread:$0]  %s4576_s1, 16384, %s24_s20, [#allocation3], %s3070_s3, %s3070_s3, %s3071_s28  }
  0x23   :  { %s3072_s10 = smov [#allocation6]   ;;  %s3040_s14 = scalar_lea.hbm %s4580_s5, 512 }
  0x24   :  { %s51_s11 = sshll.u32 %s3072_s10, 4  ;;  %p3041_p2 = scmp.ne.s32.totalorder %s4580_s5, %s3040_s14  ;;  %s52_s11 = int_to_ptr.vmem [resolvable:$true] %s51_s11 }
  0x25   :  { %p3044_p3 = scmp.lt.u32.totalorder %s3040_s14, %s4580_s5 }
  0x27   :  { %p3046_p4 = pnand %p3044_p3, %p3041_p2 }
  0x29   :  { %3049 = shalt.err (!%p3046_p4)
}
  0x2a   :  { %s3050_s22 = scalar_lea.vmem %s52_s11, 512  ;;  %p3055_p6 = scmp.lt.s32.totalorder %s52_s11, %s52_s11 }
  0x2b   :  { %p3051_p5 = scmp.ne.s32.totalorder %s52_s11, %s3050_s22  ;;  %p3056_p7 = scmp.lt.s32.totalorder %s3050_s22, %s3050_s22 }
  0x2d   :  { %p3057_p8 = por %p3056_p7, %p3055_p6 }
  0x2f   :  { %p3058_p9 = pnand %p3057_p8, %p3051_p5 }
  0x31   :  { %3061 = shalt.err (!%p3058_p9)
}
  0x32   :  { %57 = dma.hbm_to_vmem [thread:$0]  %s4580_s5, 512, %s52_s11, [#allocation5], %s3067_s15, %s3067_s15, %s3068_s16  }
  0x33   :  { %3062 = dma.done.wait [#allocation3], 16384  }
  0x34   :  { %3063 = vsyncadd [#allocation3], 4294950912 }
  0x35   :  { %3064 = dma.done.wait [#allocation5], 4608  }
  0x36   :  { %3065 = vsyncadd [#allocation5], 4294962688  ;;  %v70_v0 = vld [vmem:[#allocation2] sm:$0xff]  ;;  %v71_v2 = vld [vmem:[#allocation2 + $0x8] sm:$0xff] }
  0x37   :  { %v74_v1 = vld [vmem:[#allocation2 + $0x20] sm:$0xff]  ;;  %v75_v5 = vld [vmem:[#allocation2 + $0x28] sm:$0xff] }
  0x38   :  { %v2760_v3 = vcombine.high %v70_v0, %v74_v1  ;;  %v2759_v4 = vcombine.low %v70_v0, %v74_v1  ;;  %v78_v6 = vld [vmem:[#allocation2 + $0x40] sm:$0xff]  ;;  %v2762_v8 = vcombine.high %v71_v2, %v75_v5  ;;  %v2761_v9 = vcombine.low %v71_v2, %v75_v5  ;;  %v79_v11 = vld [vmem:[#allocation2 + $0x48] sm:$0xff] }
  0x39   :  { %v82_v7 = vld [vmem:[#allocation2 + $0x60] sm:$0xff]  ;;  %v83_v12 = vld [vmem:[#allocation2 + $0x68] sm:$0xff] }
  0x3a   :  { %v2768_v10 = vcombine.high %v78_v6, %v82_v7  ;;  %v86_v13 = vld [vmem:[#allocation2 + $0x80] sm:$0xff]  ;;  %887 = vmatprep.subr.bf16.mxu0 %v2760_v3  ;;  %v2770_v14 = vcombine.high %v79_v11, %v83_v12  ;;  %v87_v16 = vld [vmem:[#allocation2 + $0x88] sm:$0xff]  ;;  %928 = vmatprep.subr.bf16.mxu1 %v2762_v8  ;;  %v2767_v18 = vcombine.low %v78_v6, %v82_v7 }
  0x3b   :  { %v90_v15 = vld [vmem:[#allocation2 + $0xa0] sm:$0xff]  ;;  %v91_v17 = vld [vmem:[#allocation2 + $0xa8] sm:$0xff]  ;;  %888 = vmatpush1.bf16.msra.mxu0 %v2759_v4  ;;  %929 = vmatpush1.bf16.msra.mxu1 %v2761_v9  ;;  %v2769_v19 = vcombine.low %v79_v11, %v83_v12 }
  0x3c   :  { %889 = vmatprep.subr.bf16.mxu0 %v2768_v10  ;;  %v2776_v20 = vcombine.high %v86_v13, %v90_v15  ;;  %930 = vmatprep.subr.bf16.mxu1 %v2770_v14  ;;  %v2778_v21 = vcombine.high %v87_v16, %v91_v17  ;;  %v94_v22 = vld [vmem:[#allocation2 + $0xc0] sm:$0xff]  ;;  %v95_v24 = vld [vmem:[#allocation2 + $0xc8] sm:$0xff]  ;;  %v2775_v26 = vcombine.low %v86_v13, %v90_v15 }
  0x3d   :  { %v98_v23 = vld [vmem:[#allocation2 + $0xe0] sm:$0xff]  ;;  %v99_v25 = vld [vmem:[#allocation2 + $0xe8] sm:$0xff]  ;;  %v2777_v27 = vcombine.low %v87_v16, %v91_v17 }
  0x3e   :  { %v2784_v28 = vcombine.high %v94_v22, %v98_v23  ;;  %v2786_v29 = vcombine.high %v95_v24, %v99_v25  ;;  %v102_v30 = vld [vmem:[#allocation2 + $0x100] sm:$0xff]  ;;  %v103_v32 = vld [vmem:[#allocation2 + $0x108] sm:$0xff]  ;;  %v2783_v34 = vcombine.low %v94_v22, %v98_v23  ;;  %v2785_v35 = vcombine.low %v95_v24, %v99_v25 }
  0x3f   :  { %890 = vmatpush1.bf16.msra.mxu0 %v2767_v18  ;;  %931 = vmatpush1.bf16.msra.mxu1 %v2769_v19  ;;  %v106_v31 = vld [vmem:[#allocation2 + $0x120] sm:$0xff]  ;;  %v107_v33 = vld [vmem:[#allocation2 + $0x128] sm:$0xff] }
  0x40   :  { %891 = vmatprep.subr.bf16.mxu0 %v2776_v20  ;;  %932 = vmatprep.subr.bf16.mxu1 %v2778_v21  ;;  %v2792_v36 = vcombine.high %v102_v30, %v106_v31  ;;  %v2794_v37 = vcombine.high %v103_v32, %v107_v33  ;;  %v110_v38 = vld [vmem:[#allocation2 + $0x140] sm:$0xff]  ;;  %v111_v40 = vld [vmem:[#allocation2 + $0x148] sm:$0xff]  ;;  %v2791_v42 = vcombine.low %v102_v30, %v106_v31 }
  0x41   :  { %v114_v39 = vld [vmem:[#allocation2 + $0x160] sm:$0xff]  ;;  %v115_v41 = vld [vmem:[#allocation2 + $0x168] sm:$0xff]  ;;  %v2793_v43 = vcombine.low %v103_v32, %v107_v33 }
  0x42   :  { %v2800_v44 = vcombine.high %v110_v38, %v114_v39  ;;  %v2802_v45 = vcombine.high %v111_v40, %v115_v41  ;;  %v118_v46 = vld [vmem:[#allocation2 + $0x180] sm:$0xff]  ;;  %v119_v48 = vld [vmem:[#allocation2 + $0x188] sm:$0xff]  ;;  %v2799_v50 = vcombine.low %v110_v38, %v114_v39  ;;  %v2801_v51 = vcombine.low %v111_v40, %v115_v41 }
  0x43   :  { %892 = vmatpush1.bf16.msra.mxu0 %v2775_v26  ;;  %933 = vmatpush1.bf16.msra.mxu1 %v2777_v27  ;;  %v122_v47 = vld [vmem:[#allocation2 + $0x1a0] sm:$0xff]  ;;  %v123_v49 = vld [vmem:[#allocation2 + $0x1a8] sm:$0xff] }
  0x44   :  { %893 = vmatprep.subr.bf16.mxu0 %v2784_v28  ;;  %934 = vmatprep.subr.bf16.mxu1 %v2786_v29  ;;  %v2808_v52 = vcombine.high %v118_v46, %v122_v47  ;;  %v3164_v53 = vld [vmem:[%s4575_s0] sm:$0xff]  ;;  %v2810_v54 = vcombine.high %v119_v48, %v123_v49  ;;  %v127_v58 = vld [vmem:[#allocation2 + $0x1c8] sm:$0xff]  ;;  %v2807_v60 = vcombine.low %v118_v46, %v122_v47 }
  0x45   :  { %v126_v55 = vld [vmem:[#allocation2 + $0x1c0] sm:$0xff]  ;;  %v3168_v57 = vcombine.high %v3164_v53, %v3164_v53  ;;  %v131_v59 = vld [vmem:[#allocation2 + $0x1e8] sm:$0xff]  ;;  %v2809_v61 = vcombine.low %v119_v48, %v123_v49 }
  0x46   :  { %v130_v56 = vld [vmem:[#allocation2 + $0x1e0] sm:$0xff]  ;;  %v2818_v63 = vcombine.high %v127_v58, %v131_v59  ;;  %v135_v2 = vld [vmem:[#allocation2 + $0x208] sm:$0xff]  ;;  %v2817_v5 = vcombine.low %v127_v58, %v131_v59 }
  0x47   :  { %894 = vmatpush1.bf16.msra.mxu0 %v2783_v34  ;;  %935 = vmatpush1.bf16.msra.mxu1 %v2785_v35  ;;  %v2816_v62 = vcombine.high %v126_v55, %v130_v56  ;;  %v134_v0 = vld [vmem:[#allocation2 + $0x200] sm:$0xff]  ;;  %v139_v3 = vld [vmem:[#allocation2 + $0x228] sm:$0xff]  ;;  %v2815_v4 = vcombine.low %v126_v55, %v130_v56 }
  0x48   :  { %895 = vmatprep.subr.bf16.mxu0 %v2792_v36  ;;  %936 = vmatprep.subr.bf16.mxu1 %v2794_v37  ;;  %v138_v1 = vld [vmem:[#allocation2 + $0x220] sm:$0xff]  ;;  %v2826_v7 = vcombine.high %v135_v2, %v139_v3  ;;  %v143_v10 = vld [vmem:[#allocation2 + $0x248] sm:$0xff]  ;;  %v2825_v13 = vcombine.low %v135_v2, %v139_v3  ;;  %v72_v2 = vld [vmem:[#allocation2 + $0x10] sm:$0xff] }
  0x49   :  { %919 = vmatprep.mubr.bf16.mxu0 %v3168_v57  ;;  %960 = vmatprep.mubr.bf16.mxu1 %v3168_v57  ;;  %v2824_v6 = vcombine.high %v134_v0, %v138_v1  ;;  %v142_v8 = vld [vmem:[#allocation2 + $0x240] sm:$0xff]  ;;  %v147_v11 = vld [vmem:[#allocation2 + $0x268] sm:$0xff]  ;;  %v2823_v12 = vcombine.low %v134_v0, %v138_v1  ;;  %v76_v3 = vld [vmem:[#allocation2 + $0x30] sm:$0xff] }
  0x4a   :  { %v146_v9 = vld [vmem:[#allocation2 + $0x260] sm:$0xff]  ;;  %v2834_v15 = vcombine.high %v143_v10, %v147_v11  ;;  %v151_v18 = vld [vmem:[#allocation2 + $0x288] sm:$0xff]  ;;  %v2833_v21 = vcombine.low %v143_v10, %v147_v11  ;;  %v80_v10 = vld [vmem:[#allocation2 + $0x50] sm:$0xff] }
  0x4b   :  { %896 = vmatpush1.bf16.msra.mxu0 %v2791_v42  ;;  %937 = vmatpush1.bf16.msra.mxu1 %v2793_v43  ;;  %v2832_v14 = vcombine.high %v142_v8, %v146_v9  ;;  %v150_v16 = vld [vmem:[#allocation2 + $0x280] sm:$0xff]  ;;  %v155_v19 = vld [vmem:[#allocation2 + $0x2a8] sm:$0xff]  ;;  %v2831_v20 = vcombine.low %v142_v8, %v146_v9  ;;  %v2764_v8 = vcombine.high %v72_v2, %v76_v3  ;;  %v84_v11 = vld [vmem:[#allocation2 + $0x70] sm:$0xff] }
  0x4c   :  { %897 = vmatprep.subr.bf16.mxu0 %v2800_v44  ;;  %938 = vmatprep.subr.bf16.mxu1 %v2802_v45  ;;  %v154_v17 = vld [vmem:[#allocation2 + $0x2a0] sm:$0xff]  ;;  %v2842_v23 = vcombine.high %v151_v18, %v155_v19  ;;  %v159_v26 = vld [vmem:[#allocation2 + $0x2c8] sm:$0xff]  ;;  %v2841_v29 = vcombine.low %v151_v18, %v155_v19  ;;  %v88_v19 = vld [vmem:[#allocation2 + $0x90] sm:$0xff] }
  0x4d   :  { %v2840_v22 = vcombine.high %v150_v16, %v154_v17  ;;  %v158_v24 = vld [vmem:[#allocation2 + $0x2c0] sm:$0xff]  ;;  %v163_v27 = vld [vmem:[#allocation2 + $0x2e8] sm:$0xff]  ;;  %v2839_v28 = vcombine.low %v150_v16, %v154_v17  ;;  %v2772_v17 = vcombine.high %v80_v10, %v84_v11 }
  0x4e   :  { %v162_v25 = vld [vmem:[#allocation2 + $0x2e0] sm:$0xff]  ;;  %v2850_v31 = vcombine.high %v159_v26, %v163_v27  ;;  %v167_v34 = vld [vmem:[#allocation2 + $0x308] sm:$0xff]  ;;  %v2849_v37 = vcombine.low %v159_v26, %v163_v27  ;;  %v96_v26 = vld [vmem:[#allocation2 + $0xd0] sm:$0xff] }
  0x4f   :  { %898 = vmatpush1.bf16.msra.mxu0 %v2799_v50  ;;  %939 = vmatpush1.bf16.msra.mxu1 %v2801_v51  ;;  %v2848_v30 = vcombine.high %v158_v24, %v162_v25  ;;  %v166_v32 = vld [vmem:[#allocation2 + $0x300] sm:$0xff]  ;;  %v171_v35 = vld [vmem:[#allocation2 + $0x328] sm:$0xff]  ;;  %v2847_v36 = vcombine.low %v158_v24, %v162_v25  ;;  %v100_v27 = vld [vmem:[#allocation2 + $0xf0] sm:$0xff] }
  0x50   :  { %899 = vmatprep.subr.bf16.mxu0 %v2808_v52  ;;  %940 = vmatprep.subr.bf16.mxu1 %v2810_v54  ;;  %v170_v33 = vld [vmem:[#allocation2 + $0x320] sm:$0xff]  ;;  %v2858_v39 = vcombine.high %v167_v34, %v171_v35  ;;  %v175_v42 = vld [vmem:[#allocation2 + $0x348] sm:$0xff]  ;;  %v2857_v45 = vcombine.low %v167_v34, %v171_v35  ;;  %v104_v34 = vld [vmem:[#allocation2 + $0x110] sm:$0xff] }
  0x51   :  { %v2856_v38 = vcombine.high %v166_v32, %v170_v33  ;;  %v174_v40 = vld [vmem:[#allocation2 + $0x340] sm:$0xff]  ;;  %v179_v43 = vld [vmem:[#allocation2 + $0x368] sm:$0xff]  ;;  %v2855_v44 = vcombine.low %v166_v32, %v170_v33  ;;  %v2788_v32 = vcombine.high %v96_v26, %v100_v27  ;;  %v108_v35 = vld [vmem:[#allocation2 + $0x130] sm:$0xff] }
  0x52   :  { %v178_v41 = vld [vmem:[#allocation2 + $0x360] sm:$0xff]  ;;  %v2866_v47 = vcombine.high %v175_v42, %v179_v43  ;;  %v183_v50 = vld [vmem:[#allocation2 + $0x388] sm:$0xff]  ;;  %v2865_v54 = vcombine.low %v175_v42, %v179_v43  ;;  %v116_v42 = vld [vmem:[#allocation2 + $0x170] sm:$0xff] }
  0x53   :  { %900 = vmatpush1.bf16.msra.mxu0 %v2807_v60  ;;  %941 = vmatpush1.bf16.msra.mxu1 %v2809_v61  ;;  %v2864_v46 = vcombine.high %v174_v40, %v178_v41  ;;  %v182_v48 = vld [vmem:[#allocation2 + $0x380] sm:$0xff]  ;;  %v187_v51 = vld [vmem:[#allocation2 + $0x3a8] sm:$0xff]  ;;  %v2863_v52 = vcombine.low %v174_v40, %v178_v41  ;;  %v2796_v40 = vcombine.high %v104_v34, %v108_v35  ;;  %v112_v41 = vld [vmem:[#allocation2 + $0x150] sm:$0xff] }
  0x54   :  { %901 = vmatprep.subr.bf16.mxu0 %v2816_v62  ;;  %942 = vmatprep.subr.bf16.mxu1 %v2818_v63  ;;  %v186_v49 = vld [vmem:[#allocation2 + $0x3a0] sm:$0xff]  ;;  %v2874_v56 = vcombine.high %v183_v50, %v187_v51  ;;  %v191_v60 = vld [vmem:[#allocation2 + $0x3c8] sm:$0xff]  ;;  %v2873_v63 = vcombine.low %v183_v50, %v187_v51  ;;  %v113_v43 = vld [vmem:[#allocation2 + $0x158] sm:$0xff] }
  0x55   :  { %v2872_v55 = vcombine.high %v182_v48, %v186_v49  ;;  %v190_v58 = vld [vmem:[#allocation2 + $0x3c0] sm:$0xff]  ;;  %v195_v61 = vld [vmem:[#allocation2 + $0x3e8] sm:$0xff]  ;;  %v2871_v62 = vcombine.low %v182_v48, %v186_v49  ;;  %v120_v49 = vld [vmem:[#allocation2 + $0x190] sm:$0xff] }
  0x56   :  { %v194_v59 = vld [vmem:[#allocation2 + $0x3e0] sm:$0xff]  ;;  %v2882_v1 = vcombine.high %v191_v60, %v195_v61  ;;  %v124_v50 = vld [vmem:[#allocation2 + $0x1b0] sm:$0xff]  ;;  %v121_v51 = vld [vmem:[#allocation2 + $0x198] sm:$0xff] }
  0x57   :  { %902 = vmatpush1.bf16.msra.mxu0 %v2815_v4  ;;  %943 = vmatpush1.bf16.msra.mxu1 %v2817_v5  ;;  %v2880_v0 = vcombine.high %v190_v58, %v194_v59  ;;  %v73_v4 = vld [vmem:[#allocation2 + $0x18] sm:$0xff] }
  0x58   :  { %903 = vmatprep.subr.bf16.mxu0 %v2824_v6  ;;  %944 = vmatprep.subr.bf16.mxu1 %v2826_v7  ;;  %v77_v5 = vld [vmem:[#allocation2 + $0x38] sm:$0xff]  ;;  %v2879_v6 = vcombine.low %v190_v58, %v194_v59  ;;  %v2881_v7 = vcombine.low %v191_v60, %v195_v61  ;;  %v128_v59 = vld [vmem:[#allocation2 + $0x1d0] sm:$0xff] }
  0x59   :  { %v2766_v9 = vcombine.high %v73_v4, %v77_v5  ;;  %v2765_v16 = vcombine.low %v73_v4, %v77_v5  ;;  %v132_v60 = vld [vmem:[#allocation2 + $0x1f0] sm:$0xff]  ;;  %v129_v61 = vld [vmem:[#allocation2 + $0x1d8] sm:$0xff] }
  0x5a   :  { %v140_v4 = vld [vmem:[#allocation2 + $0x230] sm:$0xff]  ;;  %v137_v5 = vld [vmem:[#allocation2 + $0x218] sm:$0xff] }
  0x5b   :  { %904 = vmatpush1.bf16.msra.mxu0 %v2823_v12  ;;  %945 = vmatpush1.bf16.msra.mxu1 %v2825_v13  ;;  %v3174_v12 = vcombine.low %v3164_v53, %v3164_v53  ;;  %v81_v13 = vld [vmem:[#allocation2 + $0x58] sm:$0xff]  ;;  %v2771_v53 = vcombine.low %v80_v10, %v84_v11  ;;  %v144_v11 = vld [vmem:[#allocation2 + $0x250] sm:$0xff] }
  0x5c   :  { %905 = vmatprep.subr.bf16.mxu0 %v2832_v14  ;;  %946 = vmatprep.subr.bf16.mxu1 %v2834_v15  ;;  %v85_v14 = vld [vmem:[#allocation2 + $0x78] sm:$0xff]  ;;  %v2763_v15 = vcombine.low %v72_v2, %v76_v3  ;;  %v136_v3 = vld [vmem:[#allocation2 + $0x210] sm:$0xff] }
  0x5d   :  { %v2774_v18 = vcombine.high %v81_v13, %v85_v14 }
  0x5f   :  { %906 = vmatpush1.bf16.msra.mxu0 %v2831_v20  ;;  %947 = vmatpush1.bf16.msra.mxu1 %v2833_v21  ;;  %v92_v20 = vld [vmem:[#allocation2 + $0xb0] sm:$0xff]  ;;  %v89_v21 = vld [vmem:[#allocation2 + $0x98] sm:$0xff] }
  0x60   :  { %907 = vmatprep.subr.bf16.mxu0 %v2840_v22  ;;  %948 = vmatprep.subr.bf16.mxu1 %v2842_v23  ;;  %v93_v22 = vld [vmem:[#allocation2 + $0xb8] sm:$0xff]  ;;  %v2773_v23 = vcombine.low %v81_v13, %v85_v14  ;;  %v2780_v24 = vcombine.high %v88_v19, %v92_v20  ;;  %v148_v13 = vld [vmem:[#allocation2 + $0x270] sm:$0xff] }
  0x61   :  { %v2782_v25 = vcombine.high %v89_v21, %v93_v22  ;;  %v145_v14 = vld [vmem:[#allocation2 + $0x258] sm:$0xff] }
  0x63   :  { %908 = vmatpush1.bf16.msra.mxu0 %v2839_v28  ;;  %949 = vmatpush1.bf16.msra.mxu1 %v2841_v29  ;;  %v97_v28 = vld [vmem:[#allocation2 + $0xd8] sm:$0xff] }
  0x64   :  { %909 = vmatprep.subr.bf16.mxu0 %v2848_v30  ;;  %950 = vmatprep.subr.bf16.mxu1 %v2850_v31  ;;  %v101_v29 = vld [vmem:[#allocation2 + $0xf8] sm:$0xff]  ;;  %v2779_v30 = vcombine.low %v88_v19, %v92_v20  ;;  %v2781_v31 = vcombine.low %v89_v21, %v93_v22  ;;  %v152_v20 = vld [vmem:[#allocation2 + $0x290] sm:$0xff] }
  0x65   :  { %v2790_v33 = vcombine.high %v97_v28, %v101_v29  ;;  %v156_v21 = vld [vmem:[#allocation2 + $0x2b0] sm:$0xff]  ;;  %v153_v22 = vld [vmem:[#allocation2 + $0x298] sm:$0xff] }
  0x67   :  { %910 = vmatpush1.bf16.msra.mxu0 %v2847_v36  ;;  %951 = vmatpush1.bf16.msra.mxu1 %v2849_v37  ;;  %v105_v36 = vld [vmem:[#allocation2 + $0x118] sm:$0xff] }
  0x68   :  { %911 = vmatprep.subr.bf16.mxu0 %v2856_v38  ;;  %952 = vmatprep.subr.bf16.mxu1 %v2858_v39  ;;  %v109_v37 = vld [vmem:[#allocation2 + $0x138] sm:$0xff]  ;;  %v2787_v38 = vcombine.low %v96_v26, %v100_v27  ;;  %v2789_v39 = vcombine.low %v97_v28, %v101_v29  ;;  %v160_v27 = vld [vmem:[#allocation2 + $0x2d0] sm:$0xff] }
  0x69   :  { %v164_v28 = vld [vmem:[#allocation2 + $0x2f0] sm:$0xff]  ;;  %v161_v29 = vld [vmem:[#allocation2 + $0x2d8] sm:$0xff] }
  0x6b   :  { %912 = vmatpush1.bf16.msra.mxu0 %v2855_v44  ;;  %953 = vmatpush1.bf16.msra.mxu1 %v2857_v45  ;;  %v117_v44 = vld [vmem:[#allocation2 + $0x178] sm:$0xff]  ;;  %v2795_v45 = vcombine.low %v104_v34, %v108_v35  ;;  %v168_v35 = vld [vmem:[#allocation2 + $0x310] sm:$0xff] }
  0x6c   :  { %913 = vmatprep.subr.bf16.mxu0 %v2864_v46  ;;  %954 = vmatprep.subr.bf16.mxu1 %v2866_v47  ;;  %v2797_v46 = vcombine.low %v105_v36, %v109_v37  ;;  %v2804_v47 = vcombine.high %v112_v41, %v116_v42  ;;  %v2806_v48 = vcombine.high %v113_v43, %v117_v44 }
  0x6f   :  { %914 = vmatpush1.bf16.msra.mxu0 %v2863_v52  ;;  %955 = vmatpush1.bf16.msra.mxu1 %v2865_v54  ;;  %v125_v52 = vld [vmem:[#allocation2 + $0x1b8] sm:$0xff]  ;;  %v2803_v54 = vcombine.low %v112_v41, %v116_v42  ;;  %v176_v42 = vld [vmem:[#allocation2 + $0x350] sm:$0xff] }
  0x70   :  { %915 = vmatprep.subr.bf16.mxu0 %v2872_v55  ;;  %956 = vmatprep.subr.bf16.mxu1 %v2874_v56  ;;  %v2805_v55 = vcombine.low %v113_v43, %v117_v44  ;;  %v2812_v56 = vcombine.high %v120_v49, %v124_v50  ;;  %v2814_v58 = vcombine.high %v121_v51, %v125_v52  ;;  %v180_v43 = vld [vmem:[#allocation2 + $0x370] sm:$0xff]  ;;  %v177_v44 = vld [vmem:[#allocation2 + $0x358] sm:$0xff] }
  0x73   :  { %916 = vmatpush1.bf16.msra.mxu0 %v2871_v62  ;;  %957 = vmatpush1.bf16.msra.mxu1 %v2873_v63  ;;  %v133_v62 = vld [vmem:[#allocation2 + $0x1f8] sm:$0xff]  ;;  %v2811_v63 = vcombine.low %v120_v49, %v124_v50  ;;  %v184_v50 = vld [vmem:[#allocation2 + $0x390] sm:$0xff] }
  0x74   :  { %917 = vmatprep.subr.bf16.mxu0 %v2880_v0  ;;  %958 = vmatprep.subr.bf16.mxu1 %v2882_v1  ;;  %v2813_v0 = vcombine.low %v121_v51, %v125_v52  ;;  %v2820_v1 = vcombine.high %v128_v59, %v132_v60  ;;  %v2822_v2 = vcombine.high %v129_v61, %v133_v62  ;;  %v188_v51 = vld [vmem:[#allocation2 + $0x3b0] sm:$0xff]  ;;  %v185_v52 = vld [vmem:[#allocation2 + $0x398] sm:$0xff] }
  0x77   :  { %918 = vmatpush1.bf16.msra.mxu0 %v2879_v6  ;;  %959 = vmatpush1.bf16.msra.mxu1 %v2881_v7  ;;  %v141_v6 = vld [vmem:[#allocation2 + $0x238] sm:$0xff]  ;;  %v2819_v7 = vcombine.low %v128_v59, %v132_v60  ;;  %v192_v60 = vld [vmem:[#allocation2 + $0x3d0] sm:$0xff] }
  0x78   :  { %969 = vmatprep.subr.bf16.mxu0 %v2764_v8  ;;  %1010 = vmatprep.subr.bf16.mxu1 %v2766_v9  ;;  %v2821_v8 = vcombine.low %v129_v61, %v133_v62  ;;  %v2828_v9 = vcombine.high %v136_v3, %v140_v4  ;;  %v2830_v10 = vcombine.high %v137_v5, %v141_v6  ;;  %v196_v61 = vld [vmem:[#allocation2 + $0x3f0] sm:$0xff]  ;;  %v193_v62 = vld [vmem:[#allocation2 + $0x3d8] sm:$0xff] }
  0x7a   :  { %920 = vmatmul.mubr.bf16.vlgmr.msra.gmra.mrb[0].mxu0 %v3174_v12  ;;  %961 = vmatmul.mubr.bf16.vlgmr.msra.gmra.mrb[0].mxu1 %v3174_v12 }
  0x7b   :  { %970 = vmatpush1.bf16.msra.mxu0 %v2763_v15  ;;  %1011 = vmatpush1.bf16.msra.mxu1 %v2765_v16  ;;  %v149_v15 = vld [vmem:[#allocation2 + $0x278] sm:$0xff]  ;;  %v2827_v16 = vcombine.low %v136_v3, %v140_v4  ;;  %v2883_v4 = vcombine.low %v192_v60, %v196_v61 }
  0x7c   :  { %971 = vmatprep.subr.bf16.mxu0 %v2772_v17  ;;  %1012 = vmatprep.subr.bf16.mxu1 %v2774_v18  ;;  %v2829_v17 = vcombine.low %v137_v5, %v141_v6  ;;  %v2836_v18 = vcombine.high %v144_v11, %v148_v13  ;;  %v2838_v19 = vcombine.high %v145_v14, %v149_v15  ;;  %v200_v6 = vlaneseq }
  0x7d   :  { %1001 = vmatprep.mubr.bf16.mxu0 %v3168_v57  ;;  %1042 = vmatprep.mubr.bf16.mxu1 %v3168_v57  ;;  %v2798_v57 = vcombine.high %v105_v36, %v109_v37  ;;  %v172_v36 = vld [vmem:[#allocation2 + $0x330] sm:$0xff]  ;;  %v169_v37 = vld [vmem:[#allocation2 + $0x318] sm:$0xff] }
  0x7f   :  { %972 = vmatpush1.bf16.msra.mxu0 %v2771_v53  ;;  %1013 = vmatpush1.bf16.msra.mxu1 %v2773_v23  ;;  %v157_v53 = vld [vmem:[#allocation2 + $0x2b8] sm:$0xff]  ;;  %v2835_v23 = vcombine.low %v144_v11, %v148_v13  ;;  %v3190_v11 = vld [vmem:[%s4577_s2] sm:$0xff] }
  0x80   :  { %973 = vmatprep.subr.bf16.mxu0 %v2780_v24  ;;  %1014 = vmatprep.subr.bf16.mxu1 %v2782_v25  ;;  %v2837_v24 = vcombine.low %v145_v14, %v149_v15  ;;  %v2844_v25 = vcombine.high %v152_v20, %v156_v21  ;;  %v2846_v26 = vcombine.high %v153_v22, %v157_v53 }
  0x81   :  { %4627 = vst [vmem:[#allocation11_spill] sm:$0xff] %v3190_v11 }
  0x83   :  { %974 = vmatpush1.bf16.msra.mxu0 %v2779_v30  ;;  %1015 = vmatpush1.bf16.msra.mxu1 %v2781_v31  ;;  %v165_v30 = vld [vmem:[#allocation2 + $0x2f8] sm:$0xff]  ;;  %v2843_v31 = vcombine.low %v152_v20, %v156_v21 }
  0x84   :  { %975 = vmatprep.subr.bf16.mxu0 %v2788_v32  ;;  %1016 = vmatprep.subr.bf16.mxu1 %v2790_v33  ;;  %v2845_v32 = vcombine.low %v153_v22, %v157_v53  ;;  %v2852_v33 = vcombine.high %v160_v27, %v164_v28  ;;  %v2854_v34 = vcombine.high %v161_v29, %v165_v30 }
  0x87   :  { %976 = vmatpush1.bf16.msra.mxu0 %v2787_v38  ;;  %1017 = vmatpush1.bf16.msra.mxu1 %v2789_v39  ;;  %v173_v38 = vld [vmem:[#allocation2 + $0x338] sm:$0xff]  ;;  %v2851_v39 = vcombine.low %v160_v27, %v164_v28 }
  0x88   :  { %977 = vmatprep.subr.bf16.mxu0 %v2796_v40  ;;  %1018 = vmatprep.subr.bf16.mxu1 %v2798_v57  ;;  %v2853_v40 = vcombine.low %v161_v29, %v165_v30  ;;  %v2860_v57 = vcombine.high %v168_v35, %v172_v36  ;;  %v2862_v41 = vcombine.high %v169_v37, %v173_v38 }
  0x8b   :  { %978 = vmatpush1.bf16.msra.mxu0 %v2795_v45  ;;  %1019 = vmatpush1.bf16.msra.mxu1 %v2797_v46  ;;  %v181_v45 = vld [vmem:[#allocation2 + $0x378] sm:$0xff]  ;;  %v2859_v46 = vcombine.low %v168_v35, %v172_v36 }
  0x8c   :  { %979 = vmatprep.subr.bf16.mxu0 %v2804_v47  ;;  %1020 = vmatprep.subr.bf16.mxu1 %v2806_v48  ;;  %v2861_v47 = vcombine.low %v169_v37, %v173_v38  ;;  %v2868_v48 = vcombine.high %v176_v42, %v180_v43  ;;  %v2870_v49 = vcombine.high %v177_v44, %v181_v45 }
  0x8f   :  { %980 = vmatpush1.bf16.msra.mxu0 %v2803_v54  ;;  %1021 = vmatpush1.bf16.msra.mxu1 %v2805_v55  ;;  %v189_v54 = vld [vmem:[#allocation2 + $0x3b8] sm:$0xff]  ;;  %v2867_v55 = vcombine.low %v176_v42, %v180_v43 }
  0x90   :  { %981 = vmatprep.subr.bf16.mxu0 %v2812_v56  ;;  %1022 = vmatprep.subr.bf16.mxu1 %v2814_v58  ;;  %v2869_v56 = vcombine.low %v177_v44, %v181_v45  ;;  %v2876_v58 = vcombine.high %v184_v50, %v188_v51  ;;  %v2878_v59 = vcombine.high %v185_v52, %v189_v54 }
  0x93   :  { %982 = vmatpush1.bf16.msra.mxu0 %v2811_v63  ;;  %1023 = vmatpush1.bf16.msra.mxu1 %v2813_v0  ;;  %v197_v63 = vld [vmem:[#allocation2 + $0x3f8] sm:$0xff]  ;;  %v2875_v0 = vcombine.low %v184_v50, %v188_v51 }
  0x94   :  { %983 = vmatprep.subr.bf16.mxu0 %v2820_v1  ;;  %1024 = vmatprep.subr.bf16.mxu1 %v2822_v2  ;;  %v2877_v1 = vcombine.low %v185_v52, %v189_v54  ;;  %v2884_v2 = vcombine.high %v192_v60, %v196_v61  ;;  %v2886_v3 = vcombine.high %v193_v62, %v197_v63 }
  0x95   :  { %v2885_v5 = vcombine.low %v193_v62, %v197_v63 }
  0x97   :  { %984 = vmatpush1.bf16.msra.mxu0 %v2819_v7  ;;  %1025 = vmatpush1.bf16.msra.mxu1 %v2821_v8  ;;  %v3182_v7 = vshrl.u32 %v200_v6, 7 }
  0x98   :  { %985 = vmatprep.subr.bf16.mxu0 %v2828_v9  ;;  %1026 = vmatprep.subr.bf16.mxu1 %v2830_v10  ;;  %v3073_v9 = vmov 1966171168  }
  0x99   :  { %4625 = vst [vmem:[#allocation9_spill] sm:$0xff] %v3182_v7  ;;  %v3185_v8 = vsub.s32 0, %v3182_v7  ;;  %v1070_v10 = vunpack.c.l.s4 %v3073_v9  ;;  %v206_v13 = vsub.s32 1, %v3182_v7  ;;  %v210_v14 = vsub.s32 2, %v3182_v7 }
  0x9a   :  { %v214_v15 = vsub.s32 3, %v3182_v7 }
  0x9b   :  { %986 = vmatpush1.bf16.msra.mxu0 %v2827_v16  ;;  %1027 = vmatpush1.bf16.msra.mxu1 %v2829_v17  ;;  %4626 = vst [vmem:[#allocation10_spill] sm:$0xff] %v3185_v8  ;;  %v1071_v16 = vunpack.c.0.s8 %v1070_v10  ;;  %v207_v17 = vrot.slane %v3190_v11, %v206_v13 }
  0x9c   :  { %987 = vmatprep.subr.bf16.mxu0 %v2836_v18  ;;  %1028 = vmatprep.subr.bf16.mxu1 %v2838_v19  ;;  %v211_v18 = vrot.slane %v3190_v11, %v210_v14  ;;  %v215_v19 = vrot.slane %v3190_v11, %v214_v15 }
  0x9d   :  { %v3201_v22 = vsub.s32 %v1071_v16, %v3182_v7 }
  0x9f   :  { %988 = vmatpush1.bf16.msra.mxu0 %v2835_v23  ;;  %1029 = vmatpush1.bf16.msra.mxu1 %v2837_v24  ;;  %4628 = vst [vmem:[#allocation12_spill] sm:$0xff] %v3201_v22 }
  0xa0   :  { %989 = vmatprep.subr.bf16.mxu0 %v2844_v25  ;;  %1030 = vmatprep.subr.bf16.mxu1 %v2846_v26 }
  0xa3   :  { %990 = vmatpush1.bf16.msra.mxu0 %v2843_v31  ;;  %1031 = vmatpush1.bf16.msra.mxu1 %v2845_v32 }
  0xa4   :  { %991 = vmatprep.subr.bf16.mxu0 %v2852_v33  ;;  %1032 = vmatprep.subr.bf16.mxu1 %v2854_v34 }
  0xa7   :  { %992 = vmatpush1.bf16.msra.mxu0 %v2851_v39  ;;  %1033 = vmatpush1.bf16.msra.mxu1 %v2853_v40 }
  0xa8   :  { %993 = vmatprep.subr.bf16.mxu0 %v2860_v57  ;;  %1034 = vmatprep.subr.bf16.mxu1 %v2862_v41 }
  0xab   :  { %994 = vmatpush1.bf16.msra.mxu0 %v2859_v46  ;;  %1035 = vmatpush1.bf16.msra.mxu1 %v2861_v47 }
  0xac   :  { %995 = vmatprep.subr.bf16.mxu0 %v2868_v48  ;;  %1036 = vmatprep.subr.bf16.mxu1 %v2870_v49 }
  0xaf   :  { %996 = vmatpush1.bf16.msra.mxu0 %v2867_v55  ;;  %1037 = vmatpush1.bf16.msra.mxu1 %v2869_v56  ;;  %v1117_v56 = vld [vmem:[#allocation4] sm:$0xff] }
  0xb0   :  { %997 = vmatprep.subr.bf16.mxu0 %v2876_v58  ;;  %1038 = vmatprep.subr.bf16.mxu1 %v2878_v59  ;;  %v1118_v58 = vld [vmem:[#allocation4 + $0x8] sm:$0xff] }
  0xb3   :  { %998 = vmatpush1.bf16.msra.mxu0 %v2875_v0  ;;  %1039 = vmatpush1.bf16.msra.mxu1 %v2877_v1 }
  0xb4   :  { %999 = vmatprep.subr.bf16.mxu0 %v2884_v2  ;;  %1040 = vmatprep.subr.bf16.mxu1 %v2886_v3  ;;  %v1119_v2 = vld [vmem:[#allocation4 + $0x10] sm:$0xff]  ;;  %v1120_v3 = vld [vmem:[#allocation4 + $0x18] sm:$0xff] }
  0xb7   :  { %1000 = vmatpush1.bf16.msra.mxu0 %v2883_v4  ;;  %1041 = vmatpush1.bf16.msra.mxu1 %v2885_v5 }
  0xba   :  { %1002 = vmatmul.mubr.bf16.vlgmr.msra.gmra.mrb[4].mxu0 %v3174_v12  ;;  %1043 = vmatmul.mubr.bf16.vlgmr.msra.gmra.mrb[4].mxu1 %v3174_v12  ;;  %v203_v12 = vrot.slane %v3190_v11, %v3185_v8 }
 0x14d   :  { %v921_v20 = vpop.f32.mrb[0].mxu0  ;;  %v962_v23 = vpop.f32.mrb[0].mxu1 }
 0x14e   :  { %v922_v21 = vadd.f32 %v921_v20, %v203_v12  ;;  %v923_v53 = vpop.f32.mrb[1].mxu0  ;;  %v963_v26 = vadd.f32 %v962_v23, %v211_v18  ;;  %v964_v27 = vpop.f32.mrb[1].mxu1 }
 0x14f   :  { %v924_v24 = vadd.f32 %v923_v53, %v207_v17  ;;  %v925_v25 = vpop.f32.mrb[2].mxu0  ;;  %v965_v30 = vadd.f32 %v964_v27, %v215_v19  ;;  %v966_v31 = vpop.f32.mrb[2].mxu1 }
 0x150   :  { %v1051_v28 = vmax.f32 %v922_v21, 0.0  ;;  %v926_v29 = vpop.f32.mrb[3].mxu0  ;;  %v1053_v33 = vmax.f32 %v963_v26, 0.0  ;;  %v967_v34 = vpop.f32.mrb[3].mxu1 }
 0x151   :  { %v1052_v32 = vmax.f32 %v924_v24, 0.0  ;;  %v3208_v38 = vmax.f32 %v965_v30, 0.0 }
 0x152   :  { %1059 = vst [vmem:[%s4582_s7] sm:$0xff] %v1051_v28  ;;  %v1068_v36 = vcombine.high %v1051_v28, %v1051_v28  ;;  %v1075_v37 = vrot.slane %v1051_v28, %v3201_v22  ;;  %1061 = vst [vmem:[%s4582_s7 + $0x10] sm:$0xff] %v1053_v33  ;;  %v1385_v41 = vcombine.high %v1053_v33, %v1053_v33 }
 0x153   :  { %4629 = vst [vmem:[#allocation13_spill] sm:$0xff] %v3208_v38  ;;  %1060 = vst [vmem:[%s4582_s7 + $0x8] sm:$0xff] %v1052_v32  ;;  %v1226_v40 = vcombine.high %v1052_v32, %v1052_v32  ;;  %v1233_v57 = vrot.slane %v1052_v32, %v3201_v22  ;;  %v3219_v42 = vrot.slane %v1053_v33, %v3201_v22 }
 0x154   :  { %v1082_v43 = vrot.slane %v1068_v36, %v3201_v22  ;;  %v1083_v44 = vcombine.high %v1075_v37, %v1075_v37  ;;  %v1091_v45 = vrot.slane %v1075_v37, %v3201_v22  ;;  %1062 = vst [vmem:[%s4582_s7 + $0x18] sm:$0xff] %v3208_v38  ;;  %v3234_v50 = vrot.slane %v1385_v41, %v3201_v22 }
 0x155   :  { %4630 = vst [vmem:[#allocation14_spill] sm:$0xff] %v3219_v42  ;;  %v1240_v47 = vrot.slane %v1226_v40, %v3201_v22  ;;  %v1241_v48 = vcombine.high %v1233_v57, %v1233_v57  ;;  %v3231_v49 = vrot.slane %v1233_v57, %v3201_v22 }
 0x156   :  { %4631 = vst [vmem:[#allocation15_spill] sm:$0xff] %v3234_v50  ;;  %v1084_v51 = vcombine.high %v1082_v43, %v1082_v43  ;;  %v1098_v52 = vrot.slane %v1082_v43, %v3201_v22  ;;  %v1105_v54 = vrot.slane %v1083_v44, %v3201_v22  ;;  %v1113_v55 = vcombine.high %v1091_v45, %v1091_v45 }
 0x157   :  { %v1124_v59 = vrot.slane %v1091_v45, %v3185_v8  ;;  %v1242_v60 = vcombine.high %v1240_v47, %v1240_v47  ;;  %v3240_v61 = vrot.slane %v1240_v47, %v3201_v22  ;;  %v1263_v62 = vrot.slane %v1241_v48, %v3201_v22 }
 0x158   :  { %v1112_v63 = vrot.slane %v1084_v51, %v3201_v22  ;;  %v1114_v0 = vcombine.high %v1098_v52, %v1098_v52  ;;  %v1115_v1 = vcombine.high %v1105_v54, %v1105_v54  ;;  %v1128_v4 = vrot.slane %v1105_v54, %v3185_v8 }
 0x159   :  { %v1132_v5 = vrot.slane %v1113_v55, %v3185_v8  ;;  %v1140_v6 = vrot.slane %v1098_v52, %v3185_v8  ;;  %v3247_v9 = vmul.f32 %v1124_v59, %v1117_v56  ;;  %v3249_v10 = vmul.f32 %v1124_v59, %v1118_v58  ;;  %v1276_v55 = vld [vmem:[#allocation4 + $0x20] sm:$0xff] }
 0x15a   :  { %v1116_v13 = vcombine.high %v1112_v63, %v1112_v63  ;;  %v1136_v14 = vrot.slane %v1115_v1, %v3185_v8  ;;  %v1144_v15 = vrot.slane %v1112_v63, %v3185_v8  ;;  %v1148_v12 = vrot.slane %v1114_v0, %v3185_v8  ;;  %v1277_v1 = vld [vmem:[#allocation4 + $0x28] sm:$0xff] }
 0x15b   :  { %v3254_v16 = vmul.f32 %v1124_v59, %v1119_v2  ;;  %v3256_v17 = vmul.f32 %v1124_v59, %v1120_v3  ;;  %v3258_v18 = vmul.f32 %v1128_v4, %v1117_v56  ;;  %v3260_v19 = vmul.f32 %v1128_v4, %v1118_v58 }
 0x15c   :  { %v1152_v20 = vrot.slane %v1116_v13, %v3185_v8  ;;  %v3263_v21 = vmul.f32 %v1128_v4, %v1119_v2  ;;  %v3265_v53 = vmul.f32 %v1128_v4, %v1120_v3  ;;  %v3267_v23 = vmul.f32 %v1132_v5, %v1117_v56  ;;  %v1278_v4 = vld [vmem:[#allocation4 + $0x30] sm:$0xff] }
 0x15d   :  { %v3269_v24 = vmul.f32 %v1132_v5, %v1118_v58  ;;  %v3271_v25 = vmul.f32 %v1132_v5, %v1119_v2  ;;  %v3273_v26 = vmul.f32 %v1132_v5, %v1120_v3  ;;  %v3275_v27 = vmul.f32 %v1136_v14, %v1117_v56 }
 0x15e   :  { %v3277_v28 = vmul.f32 %v1136_v14, %v1118_v58  ;;  %v3279_v29 = vmul.f32 %v1136_v14, %v1119_v2  ;;  %v3281_v30 = vmul.f32 %v1136_v14, %v1120_v3  ;;  %v3283_v31 = vmul.f32 %v1140_v6, %v1117_v56 }
 0x15f   :  { %v3285_v32 = vmul.f32 %v1140_v6, %v1118_v58  ;;  %v3287_v33 = vmul.f32 %v1140_v6, %v1119_v2  ;;  %v3289_v34 = vmul.f32 %v1140_v6, %v1120_v3  ;;  %v3291_v36 = vmul.f32 %v1144_v15, %v1117_v56 }
 0x160   :  { %v3293_v37 = vmul.f32 %v1144_v15, %v1118_v58  ;;  %v3295_v40 = vmul.f32 %v1144_v15, %v1119_v2  ;;  %v3297_v57 = vmul.f32 %v1144_v15, %v1120_v3  ;;  %v3299_v41 = vmul.f32 %v1148_v12, %v1117_v56 }
 0x161   :  { %v3301_v43 = vmul.f32 %v1148_v12, %v1118_v58  ;;  %v3303_v44 = vmul.f32 %v1148_v12, %v1119_v2  ;;  %v3305_v45 = vmul.f32 %v1148_v12, %v1120_v3  ;;  %v3307_v47 = vmul.f32 %v1152_v20, %v1117_v56  ;;  %v1279_v56 = vld [vmem:[#allocation4 + $0x38] sm:$0xff] }
 0x162   :  { %4632 = vst [vmem:[#allocation16_spill] sm:$0xff] %v3293_v37  ;;  %4633 = vst [vmem:[#allocation17_spill] sm:$0xff] %v3295_v40  ;;  %v3309_v48 = vmul.f32 %v1152_v20, %v1118_v58  ;;  %v3311_v51 = vmul.f32 %v1152_v20, %v1119_v2  ;;  %v3313_v52 = vmul.f32 %v1152_v20, %v1120_v3 }
 0x163   :  { %4634 = vst [vmem:[#allocation18_spill] sm:$0xff] %v3297_v57  ;;  %4635 = vst [vmem:[#allocation19_spill] sm:$0xff] %v3299_v41  ;;  %v1270_v54 = vrot.slane %v1242_v60, %v3201_v22  ;;  %v1271_v59 = vcombine.high %v3231_v49, %v3231_v49  ;;  %v1272_v63 = vcombine.high %v3240_v61, %v3240_v61 }
 0x164   :  { %4636 = vst [vmem:[#allocation20_spill] sm:$0xff] %v3301_v43  ;;  %4637 = vst [vmem:[#allocation21_spill] sm:$0xff] %v3303_v44  ;;  %v1273_v0 = vcombine.high %v1263_v62, %v1263_v62  ;;  %v1283_v58 = vrot.slane %v3231_v49, %v3185_v8  ;;  %v1287_v3 = vrot.slane %v1263_v62, %v3185_v8 }
 0x165   :  { %4638 = vst [vmem:[#allocation22_spill] sm:$0xff] %v3305_v45  ;;  %4639 = vst [vmem:[#allocation23_spill] sm:$0xff] %v3307_v47  ;;  %v1274_v2 = vcombine.high %v1270_v54, %v1270_v54  ;;  %v1299_v60 = vrot.slane %v3240_v61, %v3185_v8  ;;  %v1303_v5 = vrot.slane %v1270_v54, %v3185_v8 }
 0x166   :  { %4640 = vst [vmem:[#allocation24_spill] sm:$0xff] %v3309_v48  ;;  %4641 = vst [vmem:[#allocation25_spill] sm:$0xff] %v3311_v51  ;;  %v1291_v6 = vrot.slane %v1271_v59, %v3185_v8  ;;  %v1295_v13 = vrot.slane %v1273_v0, %v3185_v8  ;;  %v1307_v14 = vrot.slane %v1272_v63, %v3185_v8 }
 0x167   :  { %4642 = vst [vmem:[#allocation26_spill] sm:$0xff] %v3313_v52  ;;  %v1320_v15 = vmul.f32 %v1283_v58, %v1276_v55  ;;  %v1311_v12 = vrot.slane %v1274_v2, %v3185_v8  ;;  %v1321_v20 = vmul.f32 %v1283_v58, %v1277_v1  ;;  %v1322_v39 = vmul.f32 %v1283_v58, %v1278_v4 }
 0x168   :  { %v1323_v49 = vmul.f32 %v1283_v58, %v1279_v56  ;;  %v1324_v35 = vmul.f32 %v1287_v3, %v1276_v55  ;;  %v1325_v46 = vmul.f32 %v1287_v3, %v1277_v1  ;;  %v1326_v62 = vmul.f32 %v1287_v3, %v1278_v4 }
 0x169   :  { %v1327_v11 = vmul.f32 %v1287_v3, %v1279_v56  ;;  %v1328_v7 = vmul.f32 %v1291_v6, %v1276_v55  ;;  %v1329_v61 = vmul.f32 %v1291_v6, %v1277_v1  ;;  %v1330_v38 = vmul.f32 %v1291_v6, %v1278_v4 }
 0x16a   :  { %v1331_v54 = vmul.f32 %v1291_v6, %v1279_v56  ;;  %v1332_v22 = vmul.f32 %v1295_v13, %v1276_v55  ;;  %v1333_v59 = vmul.f32 %v1295_v13, %v1277_v1  ;;  %v1334_v50 = vmul.f32 %v1295_v13, %v1278_v4 }
 0x16b   :  { %v1335_v0 = vmul.f32 %v1295_v13, %v1279_v56  ;;  %v1336_v42 = vmul.f32 %v1299_v60, %v1276_v55  ;;  %v1337_v63 = vmul.f32 %v1299_v60, %v1277_v1  ;;  %v1338_v52 = vmul.f32 %v1299_v60, %v1278_v4 }
 0x16c   :  { %v1339_v51 = vmul.f32 %v1299_v60, %v1279_v56  ;;  %v1340_v2 = vmul.f32 %v1303_v5, %v1276_v55  ;;  %v1341_v8 = vmul.f32 %v1303_v5, %v1277_v1  ;;  %v1342_v48 = vmul.f32 %v1303_v5, %v1278_v4 }
 0x16d   :  { %v1343_v58 = vmul.f32 %v1303_v5, %v1279_v56  ;;  %v1344_v47 = vmul.f32 %v1307_v14, %v1276_v55  ;;  %v1345_v45 = vmul.f32 %v1307_v14, %v1277_v1  ;;  %v1346_v44 = vmul.f32 %v1307_v14, %v1278_v4 }
 0x16e   :  { %v1347_v3 = vmul.f32 %v1307_v14, %v1279_v56  ;;  %v1348_v43 = vmul.f32 %v1311_v12, %v1276_v55  ;;  %v1349_v41 = vmul.f32 %v1311_v12, %v1277_v1  ;;  %v1350_v57 = vmul.f32 %v1311_v12, %v1278_v4 }
 0x16f   :  { %v1351_v6 = vmul.f32 %v1311_v12, %v1279_v56  ;;  %v3331_v40 = vadd.f32 %v1320_v15, %v3247_v9  ;;  %v3334_v13 = vadd.f32 %v1321_v20, %v3249_v10  ;;  %v3337_v60 = vadd.f32 %v1322_v39, %v3254_v16  ;;  %v4667_v15 = vld [vmem:[#allocation12_spill] sm:$0xff] }
 0x170   :  { %v3340_v37 = vadd.f32 %v1323_v49, %v3256_v17  ;;  %v3343_v5 = vadd.f32 %v1324_v35, %v3258_v18  ;;  %v3346_v55 = vadd.f32 %v1325_v46, %v3260_v19  ;;  %v3349_v1 = vadd.f32 %v1326_v62, %v3263_v21 }
 0x171   :  { %v3352_v9 = vadd.f32 %v1327_v11, %v3265_v53  ;;  %v3355_v10 = vadd.f32 %v1328_v7, %v3267_v23  ;;  %v3358_v39 = vadd.f32 %v1329_v61, %v3269_v24  ;;  %v3361_v16 = vadd.f32 %v1330_v38, %v3271_v25  ;;  %v4645_v23 = vld [vmem:[#allocation17_spill] sm:$0xff] }
 0x172   :  { %v3364_v35 = vadd.f32 %v1331_v54, %v3273_v26  ;;  %v3367_v46 = vadd.f32 %v1332_v22, %v3275_v27  ;;  %v3370_v17 = vadd.f32 %v1333_v59, %v3277_v28  ;;  %v3373_v11 = vadd.f32 %v1334_v50, %v3279_v29  ;;  %v4643_v50 = vld [vmem:[#allocation16_spill] sm:$0xff]  ;;  %v4649_v26 = vld [vmem:[#allocation19_spill] sm:$0xff] }
 0x173   :  { %v3376_v7 = vadd.f32 %v1335_v0, %v3281_v30  ;;  %v3379_v18 = vadd.f32 %v1336_v42, %v3283_v31  ;;  %v3382_v38 = vadd.f32 %v1337_v63, %v3285_v32  ;;  %v3385_v19 = vadd.f32 %v1338_v52, %v3287_v33  ;;  %v4647_v42 = vld [vmem:[#allocation18_spill] sm:$0xff]  ;;  %v4651_v28 = vld [vmem:[#allocation20_spill] sm:$0xff]  ;;  %v4653_v30 = vld [vmem:[#allocation21_spill] sm:$0xff] }
 0x174   :  { %v3388_v22 = vadd.f32 %v1339_v51, %v3289_v34  ;;  %v3391_v21 = vadd.f32 %v1340_v2, %v3291_v36  ;;  %v3394_v53 = vadd.f32 %v1341_v8, %v4643_v50  ;;  %v3397_v24 = vadd.f32 %v1342_v48, %v4645_v23  ;;  %v4655_v32 = vld [vmem:[#allocation22_spill] sm:$0xff]  ;;  %v4657_v8 = vld [vmem:[#allocation23_spill] sm:$0xff]  ;;  %v4659_v36 = vld [vmem:[#allocation24_spill] sm:$0xff] }
 0x175   :  { %v3400_v25 = vadd.f32 %v1343_v58, %v4647_v42  ;;  %v3403_v27 = vadd.f32 %v1344_v47, %v4649_v26  ;;  %v3406_v29 = vadd.f32 %v1345_v45, %v4651_v28  ;;  %v3409_v31 = vadd.f32 %v1346_v44, %v4653_v30  ;;  %v4661_v51 = vld [vmem:[#allocation25_spill] sm:$0xff]  ;;  %v4663_v47 = vld [vmem:[#allocation26_spill] sm:$0xff]  ;;  %v4666_v44 = vld [vmem:[#allocation15_spill] sm:$0xff] }
 0x176   :  { %4644 = vst [vmem:[#allocation16_spill] sm:$0xff] %v3394_v53  ;;  %4646 = vst [vmem:[#allocation17_spill] sm:$0xff] %v3397_v24  ;;  %v3412_v33 = vadd.f32 %v1347_v3, %v4655_v32  ;;  %v3415_v34 = vadd.f32 %v1348_v43, %v4657_v8  ;;  %v3418_v48 = vadd.f32 %v1349_v41, %v4659_v36  ;;  %v4665_v45 = vld [vmem:[#allocation14_spill] sm:$0xff]  ;;  %v4668_v41 = vld [vmem:[#allocation13_spill] sm:$0xff] }
 0x177   :  { %4648 = vst [vmem:[#allocation18_spill] sm:$0xff] %v3400_v25  ;;  %4650 = vst [vmem:[#allocation19_spill] sm:$0xff] %v3403_v27  ;;  %v3421_v52 = vadd.f32 %v1350_v57, %v4661_v51  ;;  %v3424_v4 = vadd.f32 %v1351_v6, %v4663_v47  ;;  %v1400_v56 = vcombine.high %v4665_v45, %v4665_v45  ;;  %v1435_v58 = vld [vmem:[#allocation4 + $0x40] sm:$0xff]  ;;  %v1436_v3 = vld [vmem:[#allocation4 + $0x48] sm:$0xff] }
 0x178   :  { %4652 = vst [vmem:[#allocation20_spill] sm:$0xff] %v3406_v29  ;;  %4654 = vst [vmem:[#allocation21_spill] sm:$0xff] %v3409_v31  ;;  %v1401_v14 = vcombine.high %v4666_v44, %v4666_v44  ;;  %v1408_v12 = vrot.slane %v4665_v45, %v4667_v15  ;;  %v1415_v43 = vrot.slane %v4666_v44, %v4667_v15  ;;  %v1437_v6 = vld [vmem:[#allocation4 + $0x50] sm:$0xff]  ;;  %v1438_v50 = vld [vmem:[#allocation4 + $0x58] sm:$0xff] }
 0x179   :  { %4656 = vst [vmem:[#allocation22_spill] sm:$0xff] %v3412_v33  ;;  %4658 = vst [vmem:[#allocation23_spill] sm:$0xff] %v3415_v34  ;;  %v3436_v20 = vrot.slane %v4668_v41, %v4667_v15  ;;  %v4670_v57 = vcombine.high %v4668_v41, %v4668_v41  ;;  %v1422_v59 = vrot.slane %v1400_v56, %v4667_v15  ;;  %v4673_v23 = vld [vmem:[#allocation10_spill] sm:$0xff] }
 0x17a   :  { %4660 = vst [vmem:[#allocation24_spill] sm:$0xff] %v3418_v48  ;;  %4662 = vst [vmem:[#allocation25_spill] sm:$0xff] %v3421_v52  ;;  %v1429_v0 = vrot.slane %v1401_v14, %v4667_v15  ;;  %v1430_v63 = vcombine.high %v1408_v12, %v1408_v12  ;;  %v1431_v2 = vcombine.high %v1415_v43, %v1415_v43 }
 0x17b   :  { %4664 = vst [vmem:[#allocation26_spill] sm:$0xff] %v3424_v4  ;;  %4669 = vst [vmem:[#allocation14_spill] sm:$0xff] %v3436_v20  ;;  %v3442_v49 = vrot.slane %v4670_v57, %v4667_v15  ;;  %v1442_v42 = vrot.slane %v1408_v12, %v4673_v23  ;;  %v1458_v26 = vrot.slane %v1415_v43, %v4673_v23 }
 0x17c   :  { %v1432_v32 = vcombine.high %v1422_v59, %v1422_v59  ;;  %v1433_v8 = vcombine.high %v1429_v0, %v1429_v0  ;;  %v1446_v36 = vrot.slane %v1422_v59, %v4673_v23  ;;  %v1450_v51 = vrot.slane %v1430_v63, %v4673_v23 }
 0x17d   :  { %4671 = vst [vmem:[#allocation15_spill] sm:$0xff] %v3442_v49  ;;  %v1462_v47 = vrot.slane %v1429_v0, %v4673_v23  ;;  %v1466_v45 = vrot.slane %v1431_v2, %v4673_v23  ;;  %v1479_v56 = vmul.f32 %v1442_v42, %v1435_v58  ;;  %v1480_v44 = vmul.f32 %v1442_v42, %v1436_v3 }
 0x17e   :  { %v1454_v14 = vrot.slane %v1432_v32, %v4673_v23  ;;  %v1470_v12 = vrot.slane %v1433_v8, %v4673_v23  ;;  %v1481_v43 = vmul.f32 %v1442_v42, %v1437_v6  ;;  %v1482_v41 = vmul.f32 %v1442_v42, %v1438_v50 }
 0x17f   :  { %v1483_v57 = vmul.f32 %v1446_v36, %v1435_v58  ;;  %v1484_v54 = vmul.f32 %v1446_v36, %v1436_v3  ;;  %v1485_v61 = vmul.f32 %v1446_v36, %v1437_v6  ;;  %v1486_v30 = vmul.f32 %v1446_v36, %v1438_v50 }
 0x180   :  { %v1487_v28 = vmul.f32 %v1450_v51, %v1435_v58  ;;  %v1488_v59 = vmul.f32 %v1450_v51, %v1436_v3  ;;  %v1489_v62 = vmul.f32 %v1450_v51, %v1437_v6  ;;  %v1490_v63 = vmul.f32 %v1450_v51, %v1438_v50 }
 0x181   :  { %v1491_v49 = vmul.f32 %v1454_v14, %v1435_v58  ;;  %v1492_v0 = vmul.f32 %v1454_v14, %v1436_v3  ;;  %v1493_v20 = vmul.f32 %v1454_v14, %v1437_v6  ;;  %v1494_v2 = vmul.f32 %v1454_v14, %v1438_v50 }
 0x182   :  { %v1495_v15 = vmul.f32 %v1458_v26, %v1435_v58  ;;  %v1496_v4 = vmul.f32 %v1458_v26, %v1436_v3  ;;  %v1497_v52 = vmul.f32 %v1458_v26, %v1437_v6  ;;  %v1498_v32 = vmul.f32 %v1458_v26, %v1438_v50 }
 0x183   :  { %v1499_v48 = vmul.f32 %v1462_v47, %v1435_v58  ;;  %v1500_v8 = vmul.f32 %v1462_v47, %v1436_v3  ;;  %v1501_v23 = vmul.f32 %v1462_v47, %v1437_v6  ;;  %v1502_v42 = vmul.f32 %v1462_v47, %v1438_v50 }
 0x184   :  { %v1503_v34 = vmul.f32 %v1466_v45, %v1435_v58  ;;  %v1504_v33 = vmul.f32 %v1466_v45, %v1436_v3  ;;  %v1505_v31 = vmul.f32 %v1466_v45, %v1437_v6  ;;  %v1506_v36 = vmul.f32 %v1466_v45, %v1438_v50  ;;  %v4697_v45 = vld [vmem:[#allocation14_spill] sm:$0xff] }
 0x185   :  { %v1507_v29 = vmul.f32 %v1470_v12, %v1435_v58  ;;  %v1508_v27 = vmul.f32 %v1470_v12, %v1436_v3  ;;  %v1509_v25 = vmul.f32 %v1470_v12, %v1437_v6  ;;  %v1510_v51 = vmul.f32 %v1470_v12, %v1438_v50  ;;  %v4690_v6 = vld [vmem:[#allocation24_spill] sm:$0xff] }
 0x186   :  { %v3461_v24 = vadd.f32 %v1479_v56, %v3331_v40  ;;  %v3464_v14 = vadd.f32 %v1480_v44, %v3334_v13  ;;  %v3467_v26 = vadd.f32 %v1481_v43, %v3337_v60  ;;  %v3470_v53 = vadd.f32 %v1482_v41, %v3340_v37  ;;  %v1594_v43 = vld [vmem:[#allocation4 + $0x60] sm:$0xff] }
 0x187   :  { %v3473_v47 = vadd.f32 %v1483_v57, %v3343_v5  ;;  %v3476_v58 = vadd.f32 %v1484_v54, %v3346_v55  ;;  %v3479_v3 = vadd.f32 %v1485_v61, %v3349_v1  ;;  %v3482_v40 = vadd.f32 %v1486_v30, %v3352_v9  ;;  %v4688_v61 = vld [vmem:[#allocation23_spill] sm:$0xff]  ;;  %v4701_v41 = vld [vmem:[#allocation9_spill] sm:$0xff] }
 0x188   :  { %v3485_v13 = vadd.f32 %v1487_v28, %v3355_v10  ;;  %v3488_v60 = vadd.f32 %v1488_v59, %v3358_v39  ;;  %v3491_v37 = vadd.f32 %v1489_v62, %v3361_v16  ;;  %v3494_v5 = vadd.f32 %v1490_v63, %v3364_v35  ;;  %v4703_v59 = vld [vmem:[#allocation11_spill] sm:$0xff] }
 0x189   :  { %v3497_v55 = vadd.f32 %v1491_v49, %v3367_v46  ;;  %v3500_v1 = vadd.f32 %v1492_v0, %v3370_v17  ;;  %v3503_v9 = vadd.f32 %v1493_v20, %v3373_v11  ;;  %v3506_v10 = vadd.f32 %v1494_v2, %v3376_v7  ;;  %v4674_v11 = vld [vmem:[#allocation16_spill] sm:$0xff]  ;;  %v4676_v7 = vld [vmem:[#allocation17_spill] sm:$0xff] }
 0x18a   :  { %v3509_v39 = vadd.f32 %v1495_v15, %v3379_v18  ;;  %v3512_v16 = vadd.f32 %v1496_v4, %v3382_v38  ;;  %v3515_v35 = vadd.f32 %v1497_v52, %v3385_v19  ;;  %v3518_v46 = vadd.f32 %v1498_v32, %v3388_v22  ;;  %v4678_v18 = vld [vmem:[#allocation18_spill] sm:$0xff]  ;;  %v4680_v38 = vld [vmem:[#allocation19_spill] sm:$0xff]  ;;  %v4682_v19 = vld [vmem:[#allocation20_spill] sm:$0xff] }
 0x18b   :  { %v3521_v17 = vadd.f32 %v1499_v48, %v3391_v21  ;;  %v3524_v20 = vadd.f32 %v1500_v8, %v4674_v11  ;;  %v3527_v49 = vadd.f32 %v1501_v23, %v4676_v7  ;;  %v3530_v15 = vadd.f32 %v1502_v42, %v4678_v18  ;;  %v4684_v22 = vld [vmem:[#allocation21_spill] sm:$0xff]  ;;  %v4686_v21 = vld [vmem:[#allocation22_spill] sm:$0xff] }
 0x18c   :  { %v3533_v4 = vadd.f32 %v1503_v34, %v4680_v38  ;;  %v3536_v52 = vadd.f32 %v1504_v33, %v4682_v19  ;;  %v3539_v62 = vadd.f32 %v1505_v31, %v4684_v22  ;;  %v3542_v48 = vadd.f32 %v1506_v36, %v4686_v21  ;;  %v4692_v23 = vld [vmem:[#allocation25_spill] sm:$0xff]  ;;  %v4694_v34 = vld [vmem:[#allocation26_spill] sm:$0xff]  ;;  %v4696_v33 = vld [vmem:[#allocation12_spill] sm:$0xff] }
 0x18d   :  { %4675 = vst [vmem:[#allocation13_spill] sm:$0xff] %v3524_v20  ;;  %4677 = vst [vmem:[#allocation16_spill] sm:$0xff] %v3527_v49  ;;  %v3545_v54 = vadd.f32 %v1507_v29, %v4688_v61  ;;  %v3548_v50 = vadd.f32 %v1508_v27, %v4690_v6  ;;  %v3551_v28 = vadd.f32 %v1509_v25, %v4692_v23  ;;  %v4698_v31 = vld [vmem:[#allocation15_spill] sm:$0xff]  ;;  %v4702_v57 = vsub.s32 4, %v4701_v41  ;;  %v3573_v0 = vpop.f32.mrb[4].mxu0  ;;  %v1595_v19 = vld [vmem:[#allocation4 + $0x68] sm:$0xff] }
 0x18e   :  { %4679 = vst [vmem:[#allocation17_spill] sm:$0xff] %v3530_v15  ;;  %4681 = vst [vmem:[#allocation18_spill] sm:$0xff] %v3533_v4  ;;  %v3554_v30 = vadd.f32 %v1510_v51, %v4694_v34  ;;  %v1567_v56 = vrot.slane %v4697_v45, %v4696_v33  ;;  %v1574_v44 = vrot.slane %v4698_v31, %v4696_v33  ;;  %v4706_v2 = vsub.s32 5, %v4701_v41  ;;  %v1596_v22 = vld [vmem:[#allocation4 + $0x70] sm:$0xff]  ;;  %v1597_v21 = vld [vmem:[#allocation4 + $0x78] sm:$0xff]  ;;  %v3590_v61 = vpop.f32.mrb[5].mxu0 }
 0x18f   :  { %4683 = vst [vmem:[#allocation19_spill] sm:$0xff] %v3536_v52  ;;  %4685 = vst [vmem:[#allocation20_spill] sm:$0xff] %v3539_v62  ;;  %v4699_v29 = vcombine.high %v4697_v45, %v4697_v45  ;;  %v4700_v27 = vcombine.high %v4698_v31, %v4698_v31  ;;  %v3571_v63 = vrot.slane %v4703_v59, %v4702_v57  ;;  %v4708_v8 = vsub.s32 6, %v4701_v41  ;;  %v3592_v6 = vpop.f32.mrb[4].mxu1  ;;  %v4714_v23 = vld [vmem:[#allocation10_spill] sm:$0xff] }
 0x190   :  { %4687 = vst [vmem:[#allocation21_spill] sm:$0xff] %v3542_v48  ;;  %4689 = vst [vmem:[#allocation22_spill] sm:$0xff] %v3545_v54  ;;  %v3578_v32 = vrot.slane %v4703_v59, %v4706_v2  ;;  %v4710_v36 = vsub.s32 7, %v4701_v41  ;;  %v1589_v11 = vcombine.high %v1567_v56, %v1567_v56  ;;  %v1590_v7 = vcombine.high %v1574_v44, %v1574_v44  ;;  %v3598_v41 = vpop.f32.mrb[5].mxu1 }
 0x191   :  { %4691 = vst [vmem:[#allocation23_spill] sm:$0xff] %v3548_v50  ;;  %4693 = vst [vmem:[#allocation24_spill] sm:$0xff] %v3551_v28  ;;  %v1581_v12 = vrot.slane %v4699_v29, %v4696_v33  ;;  %v1588_v25 = vrot.slane %v4700_v27, %v4696_v33  ;;  %v3583_v42 = vrot.slane %v4703_v59, %v4708_v8  ;;  %v1007_v27 = vpop.f32.mrb[6].mxu0  ;;  %v1048_v33 = vpop.f32.mrb[6].mxu1 }
 0x192   :  { %4695 = vst [vmem:[#allocation25_spill] sm:$0xff] %v3554_v30  ;;  %4704 = vst [vmem:[#allocation26_spill] sm:$0xff] %v3571_v63  ;;  %v3588_v51 = vrot.slane %v4703_v59, %v4710_v36  ;;  %v1601_v34 = vrot.slane %v1567_v56, %v4714_v23  ;;  %v1617_v31 = vrot.slane %v1574_v44, %v4714_v23  ;;  %v1008_v36 = vpop.f32.mrb[7].mxu0  ;;  %v1049_v44 = vpop.f32.mrb[7].mxu1 }
 0x193   :  { %4705 = vst [vmem:[#allocation14_spill] sm:$0xff] %v3573_v0  ;;  %4707 = vst [vmem:[#allocation15_spill] sm:$0xff] %v3578_v32  ;;  %v1591_v18 = vcombine.high %v1581_v12, %v1581_v12  ;;  %v1592_v38 = vcombine.high %v1588_v25, %v1588_v25  ;;  %v1605_v45 = vrot.slane %v1581_v12, %v4714_v23 }
 0x194   :  { %4709 = vst [vmem:[#allocation9_spill] sm:$0xff] %v3583_v42  ;;  %4711 = vst [vmem:[#allocation11_spill] sm:$0xff] %v3588_v51  ;;  %v1621_v29 = vrot.slane %v1588_v25, %v4714_v23  ;;  %v1609_v57 = vrot.slane %v1589_v11, %v4714_v23  ;;  %v1625_v2 = vrot.slane %v1590_v7, %v4714_v23 }
 0x195   :  { %4712 = vst [vmem:[#allocation27_spill] sm:$0xff] %v3590_v61  ;;  %4713 = vst [vmem:[#allocation28_spill] sm:$0xff] %v3592_v6  ;;  %v1613_v59 = vrot.slane %v1591_v18, %v4714_v23  ;;  %v1629_v8 = vrot.slane %v1592_v38, %v4714_v23  ;;  %v1638_v56 = vmul.f32 %v1601_v34, %v1594_v43 }
 0x196   :  { %4715 = vst [vmem:[#allocation29_spill] sm:$0xff] %v3598_v41  ;;  %v1639_v51 = vmul.f32 %v1601_v34, %v1595_v19  ;;  %v1640_v12 = vmul.f32 %v1601_v34, %v1596_v22  ;;  %v1641_v6 = vmul.f32 %v1601_v34, %v1597_v21  ;;  %v1642_v42 = vmul.f32 %v1605_v45, %v1594_v43 }
 0x197   :  { %v1643_v25 = vmul.f32 %v1605_v45, %v1595_v19  ;;  %v1644_v27 = vmul.f32 %v1605_v45, %v1596_v22  ;;  %v1645_v61 = vmul.f32 %v1605_v45, %v1597_v21  ;;  %v1646_v41 = vmul.f32 %v1609_v57, %v1594_v43 }
 0x198   :  { %v1647_v32 = vmul.f32 %v1609_v57, %v1595_v19  ;;  %v1648_v11 = vmul.f32 %v1609_v57, %v1596_v22  ;;  %v1649_v0 = vmul.f32 %v1609_v57, %v1597_v21  ;;  %v1650_v18 = vmul.f32 %v1613_v59, %v1594_v43 }
 0x199   :  { %v1651_v63 = vmul.f32 %v1613_v59, %v1595_v19  ;;  %v1652_v7 = vmul.f32 %v1613_v59, %v1596_v22  ;;  %v1653_v30 = vmul.f32 %v1613_v59, %v1597_v21  ;;  %v1654_v38 = vmul.f32 %v1617_v31, %v1594_v43 }
 0x19a   :  { %v1655_v36 = vmul.f32 %v1617_v31, %v1595_v19  ;;  %v1656_v33 = vmul.f32 %v1617_v31, %v1596_v22  ;;  %v1657_v23 = vmul.f32 %v1617_v31, %v1597_v21  ;;  %v1658_v28 = vmul.f32 %v1621_v29, %v1594_v43 }
 0x19b   :  { %v1659_v50 = vmul.f32 %v1621_v29, %v1595_v19  ;;  %v1660_v34 = vmul.f32 %v1621_v29, %v1596_v22  ;;  %v1661_v44 = vmul.f32 %v1621_v29, %v1597_v21  ;;  %v1662_v54 = vmul.f32 %v1625_v2, %v1594_v43 }
 0x19c   :  { %v1663_v48 = vmul.f32 %v1625_v2, %v1595_v19  ;;  %v1664_v62 = vmul.f32 %v1625_v2, %v1596_v22  ;;  %v1665_v45 = vmul.f32 %v1625_v2, %v1597_v21  ;;  %v1666_v52 = vmul.f32 %v1629_v8, %v1594_v43  ;;  %v4739_v2 = vld [vmem:[#allocation14_spill] sm:$0xff] }
 0x19d   :  { %v1667_v4 = vmul.f32 %v1629_v8, %v1595_v19  ;;  %v1668_v15 = vmul.f32 %v1629_v8, %v1596_v22  ;;  %v1669_v57 = vmul.f32 %v1629_v8, %v1597_v21  ;;  %v3605_v49 = vadd.f32 %v1638_v56, %v3461_v24  ;;  %v4732_v21 = vld [vmem:[#allocation23_spill] sm:$0xff] }
 0x19e   :  { %v3608_v59 = vadd.f32 %v1639_v51, %v3464_v14  ;;  %v3611_v31 = vadd.f32 %v1640_v12, %v3467_v26  ;;  %v3614_v20 = vadd.f32 %v1641_v6, %v3470_v53  ;;  %v3617_v29 = vadd.f32 %v1642_v42, %v3473_v47  ;;  %v4734_v6 = vld [vmem:[#allocation24_spill] sm:$0xff]  ;;  %v4741_v56 = vld [vmem:[#allocation27_spill] sm:$0xff] }
 0x19f   :  { %v3620_v43 = vadd.f32 %v1643_v25, %v3476_v58  ;;  %v3623_v19 = vadd.f32 %v1644_v27, %v3479_v3  ;;  %v3626_v24 = vadd.f32 %v1645_v61, %v3482_v40  ;;  %v3629_v14 = vadd.f32 %v1646_v41, %v3485_v13  ;;  %v4742_v25 = vld [vmem:[#allocation9_spill] sm:$0xff]  ;;  %v4743_v27 = vld [vmem:[#allocation28_spill] sm:$0xff] }
 0x1a0   :  { %v3632_v26 = vadd.f32 %v1647_v32, %v3488_v60  ;;  %v3635_v53 = vadd.f32 %v1648_v11, %v3491_v37  ;;  %v3638_v47 = vadd.f32 %v1649_v0, %v3494_v5  ;;  %v3641_v58 = vadd.f32 %v1650_v18, %v3497_v55  ;;  %v4745_v18 = vld [vmem:[#allocation29_spill] sm:$0xff] }
 0x1a1   :  { %v3644_v3 = vadd.f32 %v1651_v63, %v3500_v1  ;;  %v3647_v40 = vadd.f32 %v1652_v7, %v3503_v9  ;;  %v3650_v13 = vadd.f32 %v1653_v30, %v3506_v10  ;;  %v3653_v60 = vadd.f32 %v1654_v38, %v3509_v39  ;;  %v4716_v9 = vld [vmem:[#allocation13_spill] sm:$0xff]  ;;  %v4718_v10 = vld [vmem:[#allocation16_spill] sm:$0xff] }
 0x1a2   :  { %v3656_v37 = vadd.f32 %v1655_v36, %v3512_v16  ;;  %v3659_v5 = vadd.f32 %v1656_v33, %v3515_v35  ;;  %v3662_v55 = vadd.f32 %v1657_v23, %v3518_v46  ;;  %v3665_v1 = vadd.f32 %v1658_v28, %v3521_v17  ;;  %v4720_v39 = vld [vmem:[#allocation17_spill] sm:$0xff]  ;;  %v4722_v16 = vld [vmem:[#allocation18_spill] sm:$0xff]  ;;  %v4724_v35 = vld [vmem:[#allocation19_spill] sm:$0xff] }
 0x1a3   :  { %v3668_v63 = vadd.f32 %v1659_v50, %v4716_v9  ;;  %v3671_v30 = vadd.f32 %v1660_v34, %v4718_v10  ;;  %v3674_v0 = vadd.f32 %v1661_v44, %v4720_v39  ;;  %v3677_v32 = vadd.f32 %v1662_v54, %v4722_v16  ;;  %v4726_v46 = vld [vmem:[#allocation20_spill] sm:$0xff]  ;;  %v4728_v17 = vld [vmem:[#allocation21_spill] sm:$0xff]  ;;  %v4730_v50 = vld [vmem:[#allocation22_spill] sm:$0xff] }
 0x1a4   :  { %v3680_v42 = vadd.f32 %v1663_v48, %v4724_v35  ;;  %v3683_v51 = vadd.f32 %v1664_v62, %v4726_v46  ;;  %v3686_v28 = vadd.f32 %v1665_v45, %v4728_v17  ;;  %v3689_v22 = vadd.f32 %v1666_v52, %v4730_v50  ;;  %v4736_v54 = vld [vmem:[#allocation25_spill] sm:$0xff]  ;;  %v4738_v48 = vld [vmem:[#allocation26_spill] sm:$0xff]  ;;  %v4740_v62 = vld [vmem:[#allocation15_spill] sm:$0xff] }
 0x1a5   :  { %4717 = vst [vmem:[#allocation13_spill] sm:$0xff] %v3668_v63  ;;  %4719 = vst [vmem:[#allocation16_spill] sm:$0xff] %v3671_v30  ;;  %v3692_v61 = vadd.f32 %v1667_v4, %v4732_v21  ;;  %v3695_v23 = vadd.f32 %v1668_v15, %v4734_v6  ;;  %v3698_v41 = vadd.f32 %v1669_v57, %v4736_v54  ;;  %v4744_v52 = vld [vmem:[#allocation11_spill] sm:$0xff]  ;;  %v4747_v34 = vld [vmem:[#allocation12_spill] sm:$0xff] }
 0x1a6   :  { %4721 = vst [vmem:[#allocation17_spill] sm:$0xff] %v3674_v0  ;;  %4723 = vst [vmem:[#allocation18_spill] sm:$0xff] %v3677_v32  ;;  %v1004_v8 = vadd.f32 %v4739_v2, %v4738_v48  ;;  %v1006_v12 = vadd.f32 %v4741_v56, %v4740_v62  ;;  %v1045_v11 = vadd.f32 %v4743_v27, %v4742_v25  ;;  %v1754_v25 = vld [vmem:[#allocation4 + $0x88] sm:$0xff] }
 0x1a7   :  { %4725 = vst [vmem:[#allocation19_spill] sm:$0xff] %v3680_v42  ;;  %4727 = vst [vmem:[#allocation20_spill] sm:$0xff] %v3683_v51  ;;  %v1047_v7 = vadd.f32 %v4745_v18, %v4744_v52  ;;  %v4753_v27 = vld [vmem:[#allocation10_spill] sm:$0xff] }
 0x1a8   :  { %4729 = vst [vmem:[#allocation21_spill] sm:$0xff] %v3686_v28  ;;  %4731 = vst [vmem:[#allocation22_spill] sm:$0xff] %v3689_v22  ;;  %v1055_v4 = vmax.f32 %v1004_v8, 0.0  ;;  %v1056_v38 = vmax.f32 %v1006_v12, 0.0  ;;  %v1057_v36 = vmax.f32 %v1045_v11, 0.0  ;;  %v1753_v12 = vld [vmem:[#allocation4 + $0x80] sm:$0xff] }
 0x1a9   :  { %4733 = vst [vmem:[#allocation23_spill] sm:$0xff] %v3692_v61  ;;  %4735 = vst [vmem:[#allocation24_spill] sm:$0xff] %v3695_v23  ;;  %v3708_v15 = vmax.f32 %v1047_v7, 0.0 }
 0x1aa   :  { %4737 = vst [vmem:[#allocation25_spill] sm:$0xff] %v3698_v41  ;;  %1063 = vst [vmem:[%s4582_s7 + $0x20] sm:$0xff] %v1055_v4  ;;  %v1703_v33 = vcombine.high %v1055_v4, %v1055_v4  ;;  %v1710_v44 = vrot.slane %v1055_v4, %v4747_v34  ;;  %v1862_v45 = vcombine.high %v1056_v38, %v1056_v38 }
 0x1ab   :  { %4746 = vst [vmem:[#allocation26_spill] sm:$0xff] %v3708_v15  ;;  %1064 = vst [vmem:[%s4582_s7 + $0x28] sm:$0xff] %v1056_v38  ;;  %v1869_v57 = vrot.slane %v1056_v38, %v4747_v34  ;;  %v2021_v9 = vcombine.high %v1057_v36, %v1057_v36  ;;  %v3726_v10 = vrot.slane %v1057_v36, %v4747_v34 }
 0x1ac   :  { %1065 = vst [vmem:[%s4582_s7 + $0x30] sm:$0xff] %v1057_v36  ;;  %1066 = vst [vmem:[%s4582_s7 + $0x38] sm:$0xff] %v3708_v15  ;;  %v3732_v16 = vrot.slane %v3708_v15, %v4747_v34  ;;  %v1717_v35 = vrot.slane %v1703_v33, %v4747_v34  ;;  %v1718_v46 = vcombine.high %v1710_v44, %v1710_v44  ;;  %v1755_v33 = vld [vmem:[#allocation4 + $0x90] sm:$0xff] }
 0x1ad   :  { %4748 = vst [vmem:[#allocation14_spill] sm:$0xff] %v3726_v10  ;;  %v1726_v17 = vrot.slane %v1710_v44, %v4747_v34  ;;  %v3737_v50 = vrot.slane %v1862_v45, %v4747_v34  ;;  %v1877_v21 = vcombine.high %v1869_v57, %v1869_v57  ;;  %v3740_v6 = vrot.slane %v1869_v57, %v4747_v34  ;;  %v1756_v44 = vld [vmem:[#allocation4 + $0x98] sm:$0xff] }
 0x1ae   :  { %4749 = vst [vmem:[#allocation15_spill] sm:$0xff] %v3732_v16  ;;  %v3743_v54 = vrot.slane %v2021_v9, %v4747_v34  ;;  %v1719_v2 = vcombine.high %v1717_v35, %v1717_v35  ;;  %v1733_v8 = vrot.slane %v1717_v35, %v4747_v34  ;;  %v1740_v62 = vrot.slane %v1718_v46, %v4747_v34 }
 0x1af   :  { %4750 = vst [vmem:[#allocation27_spill] sm:$0xff] %v3737_v50  ;;  %4751 = vst [vmem:[#allocation9_spill] sm:$0xff] %v3740_v6  ;;  %v1748_v56 = vcombine.high %v1726_v17, %v1726_v17  ;;  %v1760_v11 = vrot.slane %v1726_v17, %v4753_v27  ;;  %v3754_v18 = vrot.slane %v3737_v50, %v4747_v34 }
 0x1b0   :  { %4752 = vst [vmem:[#allocation28_spill] sm:$0xff] %v3743_v54  ;;  %v3757_v7 = vrot.slane %v1877_v21, %v4747_v34  ;;  %v1747_v4 = vrot.slane %v1719_v2, %v4747_v34  ;;  %v1749_v38 = vcombine.high %v1733_v8, %v1733_v8  ;;  %v1750_v36 = vcombine.high %v1740_v62, %v1740_v62 }
 0x1b1   :  { %4754 = vst [vmem:[#allocation11_spill] sm:$0xff] %v3754_v18  ;;  %v1764_v45 = vrot.slane %v1740_v62, %v4753_v27  ;;  %v1768_v57 = vrot.slane %v1748_v56, %v4753_v27  ;;  %v1776_v9 = vrot.slane %v1733_v8, %v4753_v27  ;;  %v1797_v35 = vmul.f32 %v1760_v11, %v1753_v12 }
 0x1b2   :  { %4755 = vst [vmem:[#allocation29_spill] sm:$0xff] %v3757_v7  ;;  %v1798_v46 = vmul.f32 %v1760_v11, %v1754_v25  ;;  %v1751_v17 = vcombine.high %v1747_v4, %v1747_v4  ;;  %v1772_v39 = vrot.slane %v1750_v36, %v4753_v27  ;;  %v1780_v21 = vrot.slane %v1747_v4, %v4753_v27 }
 0x1b3   :  { %v1784_v48 = vrot.slane %v1749_v38, %v4753_v27  ;;  %v1799_v2 = vmul.f32 %v1760_v11, %v1755_v33  ;;  %v1800_v52 = vmul.f32 %v1760_v11, %v1756_v44  ;;  %v1801_v16 = vmul.f32 %v1764_v45, %v1753_v12 }
 0x1b4   :  { %v1802_v15 = vmul.f32 %v1764_v45, %v1754_v25  ;;  %v1788_v10 = vrot.slane %v1751_v17, %v4753_v27  ;;  %v1803_v62 = vmul.f32 %v1764_v45, %v1755_v33  ;;  %v1804_v54 = vmul.f32 %v1764_v45, %v1756_v44 }
 0x1b5   :  { %v1805_v56 = vmul.f32 %v1768_v57, %v1753_v12  ;;  %v1806_v7 = vmul.f32 %v1768_v57, %v1754_v25  ;;  %v1807_v8 = vmul.f32 %v1768_v57, %v1755_v33  ;;  %v1808_v18 = vmul.f32 %v1768_v57, %v1756_v44 }
 0x1b6   :  { %v1809_v6 = vmul.f32 %v1772_v39, %v1753_v12  ;;  %v1810_v50 = vmul.f32 %v1772_v39, %v1754_v25  ;;  %v1811_v34 = vmul.f32 %v1772_v39, %v1755_v33  ;;  %v1812_v36 = vmul.f32 %v1772_v39, %v1756_v44 }
 0x1b7   :  { %v1813_v41 = vmul.f32 %v1776_v9, %v1753_v12  ;;  %v1814_v4 = vmul.f32 %v1776_v9, %v1754_v25  ;;  %v1815_v23 = vmul.f32 %v1776_v9, %v1755_v33  ;;  %v1816_v38 = vmul.f32 %v1776_v9, %v1756_v44 }
 0x1b8   :  { %v1817_v61 = vmul.f32 %v1780_v21, %v1753_v12  ;;  %v1818_v11 = vmul.f32 %v1780_v21, %v1754_v25  ;;  %v1819_v22 = vmul.f32 %v1780_v21, %v1755_v33  ;;  %v1820_v28 = vmul.f32 %v1780_v21, %v1756_v44 }
 0x1b9   :  { %v1821_v51 = vmul.f32 %v1784_v48, %v1753_v12  ;;  %v1822_v17 = vmul.f32 %v1784_v48, %v1754_v25  ;;  %v1823_v27 = vmul.f32 %v1784_v48, %v1755_v33  ;;  %v1824_v45 = vmul.f32 %v1784_v48, %v1756_v44 }
 0x1ba   :  { %v1825_v42 = vmul.f32 %v1788_v10, %v1753_v12  ;;  %v1826_v32 = vmul.f32 %v1788_v10, %v1754_v25  ;;  %v1827_v0 = vmul.f32 %v1788_v10, %v1755_v33  ;;  %v1828_v57 = vmul.f32 %v1788_v10, %v1756_v44  ;;  %v1912_v44 = vld [vmem:[#allocation4 + $0xa0] sm:$0xff] }
 0x1bb   :  { %v3768_v30 = vadd.f32 %v1797_v35, %v3605_v49  ;;  %v3771_v39 = vadd.f32 %v1798_v46, %v3608_v59  ;;  %v3774_v9 = vadd.f32 %v1799_v2, %v3611_v31  ;;  %v3777_v63 = vadd.f32 %v1800_v52, %v3614_v20  ;;  %v4781_v35 = vld [vmem:[#allocation9_spill] sm:$0xff] }
 0x1bc   :  { %v3780_v21 = vadd.f32 %v1801_v16, %v3617_v29  ;;  %v3783_v48 = vadd.f32 %v1802_v15, %v3620_v43  ;;  %v3786_v10 = vadd.f32 %v1803_v62, %v3623_v19  ;;  %v3789_v49 = vadd.f32 %v1804_v54, %v3626_v24 }
 0x1bd   :  { %v3792_v59 = vadd.f32 %v1805_v56, %v3629_v14  ;;  %v3795_v31 = vadd.f32 %v1806_v7, %v3632_v26  ;;  %v3798_v20 = vadd.f32 %v1807_v8, %v3635_v53  ;;  %v3801_v29 = vadd.f32 %v1808_v18, %v3638_v47  ;;  %v4778_v18 = vld [vmem:[#allocation12_spill] sm:$0xff]  ;;  %v4779_v7 = vld [vmem:[#allocation27_spill] sm:$0xff] }
 0x1be   :  { %v3804_v43 = vadd.f32 %v1809_v6, %v3641_v58  ;;  %v3807_v19 = vadd.f32 %v1810_v50, %v3644_v3  ;;  %v3810_v24 = vadd.f32 %v1811_v34, %v3647_v40  ;;  %v3813_v14 = vadd.f32 %v1812_v36, %v3650_v13  ;;  %v4756_v40 = vld [vmem:[#allocation13_spill] sm:$0xff]  ;;  %v4758_v13 = vld [vmem:[#allocation16_spill] sm:$0xff]  ;;  %v4770_v6 = vld [vmem:[#allocation22_spill] sm:$0xff] }
 0x1bf   :  { %v3816_v26 = vadd.f32 %v1813_v41, %v3653_v60  ;;  %v3819_v53 = vadd.f32 %v1814_v4, %v3656_v37  ;;  %v3822_v47 = vadd.f32 %v1815_v23, %v3659_v5  ;;  %v3825_v58 = vadd.f32 %v1816_v38, %v3662_v55  ;;  %v4760_v60 = vld [vmem:[#allocation17_spill] sm:$0xff]  ;;  %v4762_v37 = vld [vmem:[#allocation18_spill] sm:$0xff]  ;;  %v4764_v5 = vld [vmem:[#allocation19_spill] sm:$0xff] }
 0x1c0   :  { %v3828_v3 = vadd.f32 %v1817_v61, %v3665_v1  ;;  %v3831_v15 = vadd.f32 %v1818_v11, %v4756_v40  ;;  %v3834_v34 = vadd.f32 %v1819_v22, %v4758_v13  ;;  %v3837_v41 = vadd.f32 %v1820_v28, %v4760_v60  ;;  %v4766_v55 = vld [vmem:[#allocation20_spill] sm:$0xff]  ;;  %v4768_v1 = vld [vmem:[#allocation21_spill] sm:$0xff]  ;;  %v4772_v22 = vld [vmem:[#allocation23_spill] sm:$0xff] }
 0x1c1   :  { %v3840_v16 = vadd.f32 %v1821_v51, %v4762_v37  ;;  %v3843_v23 = vadd.f32 %v1822_v17, %v4764_v5  ;;  %v3846_v50 = vadd.f32 %v1823_v27, %v4766_v55  ;;  %v3849_v61 = vadd.f32 %v1824_v45, %v4768_v1  ;;  %v4774_v28 = vld [vmem:[#allocation24_spill] sm:$0xff]  ;;  %v4776_v51 = vld [vmem:[#allocation25_spill] sm:$0xff]  ;;  %v1914_v56 = vld [vmem:[#allocation4 + $0xb0] sm:$0xff] }
 0x1c2   :  { %4757 = vst [vmem:[#allocation13_spill] sm:$0xff] %v3831_v15  ;;  %4759 = vst [vmem:[#allocation16_spill] sm:$0xff] %v3834_v34  ;;  %v3852_v54 = vadd.f32 %v1825_v42, %v4770_v6  ;;  %v3855_v12 = vadd.f32 %v1826_v32, %v4772_v22  ;;  %v3858_v25 = vadd.f32 %v1827_v0, %v4774_v28  ;;  %v4782_v42 = vld [vmem:[#allocation11_spill] sm:$0xff]  ;;  %v4783_v32 = vld [vmem:[#allocation29_spill] sm:$0xff] }
 0x1c3   :  { %4761 = vst [vmem:[#allocation17_spill] sm:$0xff] %v3837_v41  ;;  %4763 = vst [vmem:[#allocation18_spill] sm:$0xff] %v3840_v16  ;;  %v3861_v52 = vadd.f32 %v1828_v57, %v4776_v51  ;;  %v4780_v27 = vcombine.high %v4779_v7, %v4779_v7  ;;  %v1907_v46 = vcombine.high %v4781_v35, %v4781_v35  ;;  %v1913_v0 = vld [vmem:[#allocation4 + $0xa8] sm:$0xff]  ;;  %v1915_v8 = vld [vmem:[#allocation4 + $0xb8] sm:$0xff] }
 0x1c4   :  { %4765 = vst [vmem:[#allocation19_spill] sm:$0xff] %v3843_v23  ;;  %4767 = vst [vmem:[#allocation20_spill] sm:$0xff] %v3846_v50  ;;  %v1908_v2 = vcombine.high %v4782_v42, %v4782_v42  ;;  %v1909_v62 = vcombine.high %v4783_v32, %v4783_v32  ;;  %v4784_v36 = vld [vmem:[#allocation10_spill] sm:$0xff] }
 0x1c5   :  { %4769 = vst [vmem:[#allocation21_spill] sm:$0xff] %v3849_v61  ;;  %4771 = vst [vmem:[#allocation22_spill] sm:$0xff] %v3852_v54  ;;  %v1906_v33 = vrot.slane %v4780_v27, %v4778_v18  ;;  %v1919_v4 = vrot.slane %v4781_v35, %v4784_v36  ;;  %v1923_v11 = vrot.slane %v4783_v32, %v4784_v36 }
 0x1c6   :  { %4773 = vst [vmem:[#allocation23_spill] sm:$0xff] %v3855_v12  ;;  %4775 = vst [vmem:[#allocation24_spill] sm:$0xff] %v3858_v25  ;;  %v1935_v17 = vrot.slane %v4782_v42, %v4784_v36  ;;  %v1927_v57 = vrot.slane %v1907_v46, %v4784_v36  ;;  %v1931_v40 = vrot.slane %v1909_v62, %v4784_v36 }
 0x1c7   :  { %4777 = vst [vmem:[#allocation25_spill] sm:$0xff] %v3861_v52  ;;  %v1910_v38 = vcombine.high %v1906_v33, %v1906_v33  ;;  %v1939_v45 = vrot.slane %v1906_v33, %v4784_v36  ;;  %v1943_v13 = vrot.slane %v1908_v2, %v4784_v36  ;;  %v1956_v60 = vmul.f32 %v1919_v4, %v1912_v44 }
 0x1c8   :  { %v1957_v5 = vmul.f32 %v1919_v4, %v1913_v0  ;;  %v1958_v55 = vmul.f32 %v1919_v4, %v1914_v56  ;;  %v1959_v1 = vmul.f32 %v1919_v4, %v1915_v8  ;;  %v1960_v6 = vmul.f32 %v1923_v11, %v1912_v44 }
 0x1c9   :  { %v1947_v37 = vrot.slane %v1910_v38, %v4784_v36  ;;  %v1961_v22 = vmul.f32 %v1923_v11, %v1913_v0  ;;  %v1962_v28 = vmul.f32 %v1923_v11, %v1914_v56  ;;  %v1963_v51 = vmul.f32 %v1923_v11, %v1915_v8 }
 0x1ca   :  { %v1964_v7 = vmul.f32 %v1927_v57, %v1912_v44  ;;  %v1965_v27 = vmul.f32 %v1927_v57, %v1913_v0  ;;  %v1966_v35 = vmul.f32 %v1927_v57, %v1914_v56  ;;  %v1967_v33 = vmul.f32 %v1927_v57, %v1915_v8 }
 0x1cb   :  { %v1968_v42 = vmul.f32 %v1931_v40, %v1912_v44  ;;  %v1969_v46 = vmul.f32 %v1931_v40, %v1913_v0  ;;  %v1970_v32 = vmul.f32 %v1931_v40, %v1914_v56  ;;  %v1971_v62 = vmul.f32 %v1931_v40, %v1915_v8 }
 0x1cc   :  { %v1972_v18 = vmul.f32 %v1935_v17, %v1912_v44  ;;  %v1973_v2 = vmul.f32 %v1935_v17, %v1913_v0  ;;  %v1974_v52 = vmul.f32 %v1935_v17, %v1914_v56  ;;  %v1975_v25 = vmul.f32 %v1935_v17, %v1915_v8 }
 0x1cd   :  { %v1976_v38 = vmul.f32 %v1939_v45, %v1912_v44  ;;  %v1977_v36 = vmul.f32 %v1939_v45, %v1913_v0  ;;  %v1978_v12 = vmul.f32 %v1939_v45, %v1914_v56  ;;  %v1979_v4 = vmul.f32 %v1939_v45, %v1915_v8 }
 0x1ce   :  { %v1980_v54 = vmul.f32 %v1943_v13, %v1912_v44  ;;  %v1981_v61 = vmul.f32 %v1943_v13, %v1913_v0  ;;  %v1982_v50 = vmul.f32 %v1943_v13, %v1914_v56  ;;  %v1983_v11 = vmul.f32 %v1943_v13, %v1915_v8 }
 0x1cf   :  { %v1984_v23 = vmul.f32 %v1947_v37, %v1912_v44  ;;  %v1985_v16 = vmul.f32 %v1947_v37, %v1913_v0  ;;  %v1986_v41 = vmul.f32 %v1947_v37, %v1914_v56  ;;  %v1987_v57 = vmul.f32 %v1947_v37, %v1915_v8 }
 0x1d0   :  { %v3885_v34 = vadd.f32 %v1956_v60, %v3768_v30  ;;  %v3888_v40 = vadd.f32 %v1957_v5, %v3771_v39  ;;  %v3891_v17 = vadd.f32 %v1958_v55, %v3774_v9  ;;  %v3894_v15 = vadd.f32 %v1959_v1, %v3777_v63  ;;  %v4803_v55 = vld [vmem:[#allocation24_spill] sm:$0xff] }
 0x1d1   :  { %v3897_v45 = vadd.f32 %v1960_v6, %v3780_v21  ;;  %v3900_v44 = vadd.f32 %v1961_v22, %v3783_v48  ;;  %v3903_v0 = vadd.f32 %v1962_v28, %v3786_v10  ;;  %v3906_v30 = vadd.f32 %v1963_v51, %v3789_v49  ;;  %v4809_v28 = vld [vmem:[#allocation14_spill] sm:$0xff] }
 0x1d2   :  { %v3909_v39 = vadd.f32 %v1964_v7, %v3792_v59  ;;  %v3912_v9 = vadd.f32 %v1965_v27, %v3795_v31  ;;  %v3915_v63 = vadd.f32 %v1966_v35, %v3798_v20  ;;  %v3918_v21 = vadd.f32 %v1967_v33, %v3801_v29  ;;  %v4814_v33 = vld [vmem:[#allocation15_spill] sm:$0xff] }
 0x1d3   :  { %v3921_v48 = vadd.f32 %v1968_v42, %v3804_v43  ;;  %v3924_v10 = vadd.f32 %v1969_v46, %v3807_v19  ;;  %v3927_v49 = vadd.f32 %v1970_v32, %v3810_v24  ;;  %v3930_v59 = vadd.f32 %v1971_v62, %v3813_v14  ;;  %v4785_v24 = vld [vmem:[#allocation13_spill] sm:$0xff]  ;;  %v4787_v14 = vld [vmem:[#allocation16_spill] sm:$0xff] }
 0x1d4   :  { %v3933_v31 = vadd.f32 %v1972_v18, %v3816_v26  ;;  %v3936_v20 = vadd.f32 %v1973_v2, %v3819_v53  ;;  %v3939_v29 = vadd.f32 %v1974_v52, %v3822_v47  ;;  %v3942_v43 = vadd.f32 %v1975_v25, %v3825_v58  ;;  %v4789_v26 = vld [vmem:[#allocation17_spill] sm:$0xff]  ;;  %v4791_v53 = vld [vmem:[#allocation18_spill] sm:$0xff]  ;;  %v4793_v47 = vld [vmem:[#allocation19_spill] sm:$0xff] }
 0x1d5   :  { %v3945_v19 = vadd.f32 %v1976_v38, %v3828_v3  ;;  %v3948_v56 = vadd.f32 %v1977_v36, %v4785_v24  ;;  %v3951_v8 = vadd.f32 %v1978_v12, %v4787_v14  ;;  %v3954_v18 = vadd.f32 %v1979_v4, %v4789_v26  ;;  %v4795_v58 = vld [vmem:[#allocation20_spill] sm:$0xff]  ;;  %v4797_v3 = vld [vmem:[#allocation21_spill] sm:$0xff]  ;;  %v4799_v36 = vld [vmem:[#allocation22_spill] sm:$0xff] }
 0x1d6   :  { %v3957_v13 = vadd.f32 %v1980_v54, %v4791_v53  ;;  %v3960_v52 = vadd.f32 %v1981_v61, %v4793_v47  ;;  %v3963_v25 = vadd.f32 %v1982_v50, %v4795_v58  ;;  %v3966_v60 = vadd.f32 %v1983_v11, %v4797_v3  ;;  %v4801_v12 = vld [vmem:[#allocation23_spill] sm:$0xff]  ;;  %v4805_v54 = vld [vmem:[#allocation25_spill] sm:$0xff]  ;;  %v4807_v61 = vld [vmem:[#allocation28_spill] sm:$0xff] }
 0x1d7   :  { %4786 = vst [vmem:[#allocation27_spill] sm:$0xff] %v3948_v56  ;;  %4788 = vst [vmem:[#allocation9_spill] sm:$0xff] %v3951_v8  ;;  %v3969_v37 = vadd.f32 %v1984_v23, %v4799_v36  ;;  %v3972_v5 = vadd.f32 %v1985_v16, %v4801_v12  ;;  %v3975_v1 = vadd.f32 %v1986_v41, %v4803_v55  ;;  %v4808_v50 = vld [vmem:[#allocation12_spill] sm:$0xff]  ;;  %v4811_v41 = vld [vmem:[#allocation26_spill] sm:$0xff] }
 0x1d8   :  { %4790 = vst [vmem:[#allocation11_spill] sm:$0xff] %v3954_v18  ;;  %4792 = vst [vmem:[#allocation29_spill] sm:$0xff] %v3957_v13  ;;  %v3978_v6 = vadd.f32 %v1987_v57, %v4805_v54  ;;  %v2037_v22 = vcombine.high %v4807_v61, %v4807_v61  ;;  %v2044_v51 = vrot.slane %v4809_v28, %v4808_v50  ;;  %v2071_v4 = vld [vmem:[#allocation4 + $0xc0] sm:$0xff]  ;;  %v2072_v11 = vld [vmem:[#allocation4 + $0xc8] sm:$0xff] }
 0x1d9   :  { %4794 = vst [vmem:[#allocation13_spill] sm:$0xff] %v3960_v52  ;;  %4796 = vst [vmem:[#allocation16_spill] sm:$0xff] %v3963_v25  ;;  %v2051_v7 = vrot.slane %v4807_v61, %v4808_v50  ;;  %v4810_v16 = vcombine.high %v4809_v28, %v4809_v28  ;;  %v4812_v27 = vcombine.high %v4811_v41, %v4811_v41  ;;  %v2073_v57 = vld [vmem:[#allocation4 + $0xd0] sm:$0xff]  ;;  %v2074_v24 = vld [vmem:[#allocation4 + $0xd8] sm:$0xff] }
 0x1da   :  { %4798 = vst [vmem:[#allocation17_spill] sm:$0xff] %v3966_v60  ;;  %4800 = vst [vmem:[#allocation18_spill] sm:$0xff] %v3969_v37  ;;  %v4000_v46 = vrot.slane %v4814_v33, %v4808_v50  ;;  %v2065_v32 = vrot.slane %v2037_v22, %v4808_v50  ;;  %v2066_v62 = vcombine.high %v2044_v51, %v2044_v51  ;;  %v4816_v14 = vld [vmem:[#allocation10_spill] sm:$0xff] }
 0x1db   :  { %4802 = vst [vmem:[#allocation19_spill] sm:$0xff] %v3972_v5  ;;  %4804 = vst [vmem:[#allocation20_spill] sm:$0xff] %v3975_v1  ;;  %v2058_v23 = vrot.slane %v4810_v16, %v4808_v50  ;;  %v3994_v35 = vrot.slane %v4812_v27, %v4808_v50  ;;  %v2067_v2 = vcombine.high %v2051_v7, %v2051_v7 }
 0x1dc   :  { %4806 = vst [vmem:[#allocation21_spill] sm:$0xff] %v3978_v6  ;;  %4815 = vst [vmem:[#allocation23_spill] sm:$0xff] %v4000_v46  ;;  %v2078_v26 = vrot.slane %v2044_v51, %v4816_v14  ;;  %v2094_v47 = vrot.slane %v2051_v7, %v4816_v14  ;;  %v2069_v3 = vcombine.high %v2065_v32, %v2065_v32 }
 0x1dd   :  { %4813 = vst [vmem:[#allocation22_spill] sm:$0xff] %v3994_v35  ;;  %v2068_v38 = vcombine.high %v2058_v23, %v2058_v23  ;;  %v2082_v53 = vrot.slane %v2058_v23, %v4816_v14  ;;  %v2086_v36 = vrot.slane %v2066_v62, %v4816_v14  ;;  %v2098_v55 = vrot.slane %v2065_v32, %v4816_v14 }
 0x1de   :  { %v2102_v54 = vrot.slane %v2067_v2, %v4816_v14  ;;  %v2115_v61 = vmul.f32 %v2078_v26, %v2071_v4  ;;  %v2116_v22 = vmul.f32 %v2078_v26, %v2072_v11  ;;  %v2117_v28 = vmul.f32 %v2078_v26, %v2073_v57 }
 0x1df   :  { %v2090_v12 = vrot.slane %v2068_v38, %v4816_v14  ;;  %v2106_v51 = vrot.slane %v2069_v3, %v4816_v14  ;;  %v2118_v16 = vmul.f32 %v2078_v26, %v2074_v24  ;;  %v2119_v23 = vmul.f32 %v2082_v53, %v2071_v4 }
 0x1e0   :  { %v2120_v7 = vmul.f32 %v2082_v53, %v2072_v11  ;;  %v2121_v41 = vmul.f32 %v2082_v53, %v2073_v57  ;;  %v2122_v27 = vmul.f32 %v2082_v53, %v2074_v24  ;;  %v2123_v58 = vmul.f32 %v2086_v36, %v2071_v4 }
 0x1e1   :  { %v2124_v42 = vmul.f32 %v2086_v36, %v2072_v11  ;;  %v2125_v46 = vmul.f32 %v2086_v36, %v2073_v57  ;;  %v2126_v62 = vmul.f32 %v2086_v36, %v2074_v24  ;;  %v2127_v33 = vmul.f32 %v2090_v12, %v2071_v4 }
 0x1e2   :  { %v2128_v38 = vmul.f32 %v2090_v12, %v2072_v11  ;;  %v2129_v35 = vmul.f32 %v2090_v12, %v2073_v57  ;;  %v2130_v32 = vmul.f32 %v2090_v12, %v2074_v24  ;;  %v2131_v50 = vmul.f32 %v2094_v47, %v2071_v4 }
 0x1e3   :  { %v2132_v2 = vmul.f32 %v2094_v47, %v2072_v11  ;;  %v2133_v6 = vmul.f32 %v2094_v47, %v2073_v57  ;;  %v2134_v1 = vmul.f32 %v2094_v47, %v2074_v24  ;;  %v2135_v5 = vmul.f32 %v2098_v55, %v2071_v4 }
 0x1e4   :  { %v2136_v37 = vmul.f32 %v2098_v55, %v2072_v11  ;;  %v2137_v3 = vmul.f32 %v2098_v55, %v2073_v57  ;;  %v2138_v26 = vmul.f32 %v2098_v55, %v2074_v24  ;;  %v2139_v14 = vmul.f32 %v2102_v54, %v2071_v4 }
 0x1e5   :  { %v2140_v60 = vmul.f32 %v2102_v54, %v2072_v11  ;;  %v2141_v25 = vmul.f32 %v2102_v54, %v2073_v57  ;;  %v2142_v53 = vmul.f32 %v2102_v54, %v2074_v24  ;;  %v2143_v52 = vmul.f32 %v2106_v51, %v2071_v4 }
 0x1e6   :  { %v2144_v13 = vmul.f32 %v2106_v51, %v2072_v11  ;;  %v2145_v18 = vmul.f32 %v2106_v51, %v2073_v57  ;;  %v2146_v36 = vmul.f32 %v2106_v51, %v2074_v24  ;;  %v4014_v8 = vadd.f32 %v2115_v61, %v3885_v34  ;;  %v4833_v57 = vld [vmem:[#allocation19_spill] sm:$0xff] }
 0x1e7   :  { %v4017_v12 = vadd.f32 %v2116_v22, %v3888_v40  ;;  %v4020_v47 = vadd.f32 %v2117_v28, %v3891_v17  ;;  %v4023_v56 = vadd.f32 %v2118_v16, %v3894_v15  ;;  %v4026_v55 = vadd.f32 %v2119_v23, %v3897_v45  ;;  %v4840_v22 = vld [vmem:[#allocation22_spill] sm:$0xff]  ;;  %v4844_v23 = vld [vmem:[#allocation23_spill] sm:$0xff] }
 0x1e8   :  { %v4029_v4 = vadd.f32 %v2120_v7, %v3900_v44  ;;  %v4032_v11 = vadd.f32 %v2121_v41, %v3903_v0  ;;  %v4035_v34 = vadd.f32 %v2122_v27, %v3906_v30  ;;  %v4038_v40 = vadd.f32 %v2123_v58, %v3909_v39  ;;  %v4835_v58 = vld [vmem:[#allocation20_spill] sm:$0xff]  ;;  %v2230_v7 = vld [vmem:[#allocation4 + $0xe0] sm:$0xff]  ;;  %v2231_v41 = vld [vmem:[#allocation4 + $0xe8] sm:$0xff] }
 0x1e9   :  { %v4041_v17 = vadd.f32 %v2124_v42, %v3912_v9  ;;  %v4044_v15 = vadd.f32 %v2125_v46, %v3915_v63  ;;  %v4047_v45 = vadd.f32 %v2126_v62, %v3918_v21  ;;  %v4050_v44 = vadd.f32 %v2127_v33, %v3921_v48  ;;  %v4845_v27 = vld [vmem:[#allocation10_spill] sm:$0xff] }
 0x1ea   :  { %v4053_v0 = vadd.f32 %v2128_v38, %v3924_v10  ;;  %v4056_v30 = vadd.f32 %v2129_v35, %v3927_v49  ;;  %v4059_v39 = vadd.f32 %v2130_v32, %v3930_v59  ;;  %v4062_v9 = vadd.f32 %v2131_v50, %v3933_v31  ;;  %v4817_v49 = vld [vmem:[#allocation27_spill] sm:$0xff]  ;;  %v4819_v59 = vld [vmem:[#allocation9_spill] sm:$0xff] }
 0x1eb   :  { %v4065_v63 = vadd.f32 %v2132_v2, %v3936_v20  ;;  %v4068_v21 = vadd.f32 %v2133_v6, %v3939_v29  ;;  %v4071_v48 = vadd.f32 %v2134_v1, %v3942_v43  ;;  %v4074_v10 = vadd.f32 %v2135_v5, %v3945_v19  ;;  %v4821_v31 = vld [vmem:[#allocation11_spill] sm:$0xff]  ;;  %v4823_v20 = vld [vmem:[#allocation29_spill] sm:$0xff]  ;;  %v4827_v43 = vld [vmem:[#allocation16_spill] sm:$0xff] }
 0x1ec   :  { %v4077_v35 = vadd.f32 %v2136_v37, %v4817_v49  ;;  %v4080_v33 = vadd.f32 %v2137_v3, %v4819_v59  ;;  %v4083_v50 = vadd.f32 %v2138_v26, %v4821_v31  ;;  %v4086_v42 = vadd.f32 %v2139_v14, %v4823_v20  ;;  %v4825_v29 = vld [vmem:[#allocation13_spill] sm:$0xff]  ;;  %v4831_v37 = vld [vmem:[#allocation18_spill] sm:$0xff]  ;;  %v2232_v2 = vld [vmem:[#allocation4 + $0xf0] sm:$0xff] }
 0x1ed   :  { %v4089_v6 = vadd.f32 %v2140_v60, %v4825_v29  ;;  %v4092_v1 = vadd.f32 %v2141_v25, %v4827_v43  ;;  %v4829_v19 = vld [vmem:[#allocation17_spill] sm:$0xff]  ;;  %v4098_v46 = vadd.f32 %v2143_v52, %v4831_v37  ;;  %v4101_v24 = vadd.f32 %v2144_v13, %v4833_v57  ;;  %v4839_v60 = vld [vmem:[#allocation12_spill] sm:$0xff]  ;;  %v4841_v25 = vld [vmem:[#allocation15_spill] sm:$0xff] }
 0x1ee   :  { %4818 = vst [vmem:[#allocation24_spill] sm:$0xff] %v4077_v35  ;;  %4820 = vst [vmem:[#allocation25_spill] sm:$0xff] %v4080_v33  ;;  %v4095_v5 = vadd.f32 %v2142_v53, %v4829_v19  ;;  %v4104_v54 = vadd.f32 %v2145_v18, %v4835_v58  ;;  %v4837_v14 = vld [vmem:[#allocation21_spill] sm:$0xff]  ;;  %v2210_v28 = vrot.slane %v4840_v22, %v4839_v60  ;;  %v4123_v3 = vld [vmem:[#allocation4 + $0xf8] sm:$0xff] }
 0x1ef   :  { %4822 = vst [vmem:[#allocation28_spill] sm:$0xff] %v4083_v50  ;;  %4824 = vst [vmem:[#allocation14_spill] sm:$0xff] %v4086_v42  ;;  %v4107_v61 = vadd.f32 %v2146_v36, %v4837_v14  ;;  %v4842_v51 = vcombine.high %v4841_v25, %v4841_v25  ;;  %v4843_v52 = vcombine.high %v4840_v22, %v4840_v22 }
 0x1f0   :  { %4826 = vst [vmem:[#allocation26_spill] sm:$0xff] %v4089_v6  ;;  %4828 = vst [vmem:[#allocation27_spill] sm:$0xff] %v4092_v1  ;;  %v2225_v18 = vcombine.high %v4844_v23, %v4844_v23  ;;  %v2237_v62 = vrot.slane %v4844_v23, %v4845_v27  ;;  %v2226_v38 = vcombine.high %v2210_v28, %v2210_v28 }
 0x1f1   :  { %4830 = vst [vmem:[#allocation9_spill] sm:$0xff] %v4095_v5  ;;  %4832 = vst [vmem:[#allocation11_spill] sm:$0xff] %v4098_v46  ;;  %v2217_v16 = vrot.slane %v4842_v51, %v4839_v60  ;;  %v2224_v13 = vrot.slane %v4843_v52, %v4839_v60  ;;  %v2253_v49 = vrot.slane %v2210_v28, %v4845_v27 }
 0x1f2   :  { %4834 = vst [vmem:[#allocation29_spill] sm:$0xff] %v4101_v24  ;;  %4836 = vst [vmem:[#allocation13_spill] sm:$0xff] %v4104_v54  ;;  %v2245_v36 = vrot.slane %v2225_v18, %v4845_v27  ;;  %v2261_v20 = vrot.slane %v2226_v38, %v4845_v27  ;;  %v2274_v29 = vmul.f32 %v2237_v62, %v2230_v7 }
 0x1f3   :  { %4838 = vst [vmem:[#allocation16_spill] sm:$0xff] %v4107_v61  ;;  %v2227_v32 = vcombine.high %v2217_v16, %v2217_v16  ;;  %v2241_v26 = vrot.slane %v2217_v16, %v4845_v27  ;;  %v2228_v53 = vcombine.high %v2224_v13, %v2224_v13  ;;  %v2257_v59 = vrot.slane %v2224_v13, %v4845_v27 }
 0x1f4   :  { %v2275_v43 = vmul.f32 %v2237_v62, %v2231_v41  ;;  %v2276_v37 = vmul.f32 %v2237_v62, %v2232_v2  ;;  %v2277_v57 = vmul.f32 %v2237_v62, %v4123_v3  ;;  %v2282_v28 = vmul.f32 %v2245_v36, %v2230_v7 }
 0x1f5   :  { %v2249_v31 = vrot.slane %v2227_v32, %v4845_v27  ;;  %v4132_v19 = vrot.slane %v2228_v53, %v4845_v27  ;;  %v2278_v58 = vmul.f32 %v2241_v26, %v2230_v7  ;;  %v2279_v14 = vmul.f32 %v2241_v26, %v2231_v41 }
 0x1f6   :  { %v2280_v60 = vmul.f32 %v2241_v26, %v2232_v2  ;;  %v2281_v22 = vmul.f32 %v2241_v26, %v4123_v3  ;;  %v2283_v25 = vmul.f32 %v2245_v36, %v2231_v41  ;;  %v2284_v51 = vmul.f32 %v2245_v36, %v2232_v2 }
 0x1f7   :  { %v2285_v16 = vmul.f32 %v2245_v36, %v4123_v3  ;;  %v2286_v52 = vmul.f32 %v2249_v31, %v2230_v7  ;;  %v2287_v13 = vmul.f32 %v2249_v31, %v2231_v41  ;;  %v2288_v23 = vmul.f32 %v2249_v31, %v2232_v2 }
 0x1f8   :  { %v2289_v18 = vmul.f32 %v2249_v31, %v4123_v3  ;;  %v2290_v27 = vmul.f32 %v2253_v49, %v2230_v7  ;;  %v2291_v38 = vmul.f32 %v2253_v49, %v2231_v41  ;;  %v2292_v32 = vmul.f32 %v2253_v49, %v2232_v2 }
 0x1f9   :  { %v2293_v62 = vmul.f32 %v2253_v49, %v4123_v3  ;;  %v2294_v53 = vmul.f32 %v2257_v59, %v2230_v7  ;;  %v2295_v61 = vmul.f32 %v2257_v59, %v2231_v41  ;;  %v2296_v54 = vmul.f32 %v2257_v59, %v2232_v2 }
 0x1fa   :  { %v2297_v26 = vmul.f32 %v2257_v59, %v4123_v3  ;;  %v2298_v24 = vmul.f32 %v2261_v20, %v2230_v7  ;;  %v2299_v46 = vmul.f32 %v2261_v20, %v2231_v41  ;;  %v2300_v5 = vmul.f32 %v2261_v20, %v2232_v2 }
 0x1fb   :  { %v2301_v36 = vmul.f32 %v2261_v20, %v4123_v3  ;;  %v2302_v1 = vmul.f32 %v4132_v19, %v2230_v7  ;;  %v2303_v6 = vmul.f32 %v4132_v19, %v2231_v41  ;;  %v2304_v31 = vmul.f32 %v4132_v19, %v2232_v2 }
 0x1fc   :  { %v2306_v42 = vadd.f32 %v2274_v29, %v4014_v8  ;;  %v2307_v49 = vadd.f32 %v2275_v43, %v4017_v12  ;;  %v2308_v50 = vadd.f32 %v2276_v37, %v4020_v47  ;;  %v2309_v33 = vadd.f32 %v2277_v57, %v4023_v56  ;;  %v4846_v29 = vld [vmem:[#allocation24_spill] sm:$0xff]  ;;  %v4847_v43 = vld [vmem:[#allocation25_spill] sm:$0xff]  ;;  %v4849_v57 = vld [vmem:[#allocation14_spill] sm:$0xff] }
 0x1fd   :  { %v2310_v59 = vadd.f32 %v2278_v58, %v4026_v55  ;;  %v2311_v35 = vadd.f32 %v2279_v14, %v4029_v4  ;;  %v2312_v20 = vadd.f32 %v2280_v60, %v4032_v11  ;;  %v2313_v7 = vadd.f32 %v2281_v22, %v4035_v34  ;;  %v4848_v37 = vld [vmem:[#allocation28_spill] sm:$0xff]  ;;  %v4850_v58 = vld [vmem:[#allocation26_spill] sm:$0xff]  ;;  %v4851_v14 = vld [vmem:[#allocation27_spill] sm:$0xff] }
 0x1fe   :  { %v2314_v41 = vadd.f32 %v2282_v28, %v4038_v40  ;;  %v2315_v2 = vadd.f32 %v2283_v25, %v4041_v17  ;;  %v2316_v8 = vadd.f32 %v2284_v51, %v4044_v15  ;;  %v2317_v12 = vadd.f32 %v2285_v16, %v4047_v45  ;;  %v4852_v60 = vld [vmem:[#allocation9_spill] sm:$0xff] }
 0x1ff   :  { %v2318_v47 = vadd.f32 %v2286_v52, %v4050_v44  ;;  %v2319_v56 = vadd.f32 %v2287_v13, %v4053_v0  ;;  %v2320_v55 = vadd.f32 %v2288_v23, %v4056_v30  ;;  %v2321_v4 = vadd.f32 %v2289_v18, %v4059_v39 }
 0x200   :  { %v2322_v11 = vadd.f32 %v2290_v27, %v4062_v9  ;;  %v2323_v34 = vadd.f32 %v2291_v38, %v4065_v63  ;;  %v2324_v40 = vadd.f32 %v2292_v32, %v4068_v21  ;;  %v2325_v17 = vadd.f32 %v2293_v62, %v4071_v48  ;;  %v4853_v21 = vld [vmem:[#allocation11_spill] sm:$0xff]  ;;  %v4854_v48 = vld [vmem:[#allocation29_spill] sm:$0xff] }
 0x201   :  { %v2326_v15 = vadd.f32 %v2294_v53, %v4074_v10  ;;  %v2327_v45 = vadd.f32 %v2295_v61, %v4846_v29  ;;  %v2328_v44 = vadd.f32 %v2296_v54, %v4847_v43  ;;  %v2329_v0 = vadd.f32 %v2297_v26, %v4848_v37  ;;  %v4855_v61 = vld [vmem:[#allocation13_spill] sm:$0xff] }
 0x202   :  { %v2330_v30 = vadd.f32 %v2298_v24, %v4849_v57  ;;  %v2331_v39 = vadd.f32 %v2299_v46, %v4850_v58  ;;  %v2332_v9 = vadd.f32 %v2300_v5, %v4851_v14  ;;  %v4172_v63 = vadd.f32 %v2301_v36, %v4852_v60  ;;  %v4186_v24 = vld [vmem:[%s4579_s4] sm:$0xff]  ;;  %v4191_v5 = vld [vmem:[%s4579_s4 + $0x8] sm:$0xff]  ;;  %v4856_v36 = vld [vmem:[#allocation16_spill] sm:$0xff] }
 0x203   :  { %v4175_v22 = vadd.f32 %v2302_v1, %v4853_v21  ;;  %v4178_v10 = vadd.f32 %v2303_v6, %v4854_v48  ;;  %v4181_v28 = vadd.f32 %v2304_v31, %v4855_v61  ;;  %v4196_v1 = vld [vmem:[%s4579_s4 + $0x10] sm:$0xff]  ;;  %v4201_v6 = vld [vmem:[%s4579_s4 + $0x18] sm:$0xff]  ;;  %v4204_v46 = vadd.f32 %v4186_v24, %v2306_v42 }
 0x204   :  { %v4207_v54 = vadd.f32 %v4191_v5, %v2307_v49  ;;  %v2305_v25 = vmul.f32 %v4132_v19, %v4123_v3  ;;  %v4212_v51 = vadd.f32 %v4196_v1, %v2308_v50  ;;  %v4215_v16 = vadd.f32 %v4201_v6, %v2309_v33 }
 0x205   :  { %v4218_v52 = vadd.f32 %v4186_v24, %v2310_v59  ;;  %v4221_v13 = vadd.f32 %v4191_v5, %v2311_v35  ;;  %v4224_v42 = vadd.f32 %v4196_v1, %v2312_v20  ;;  %v4227_v23 = vadd.f32 %v4201_v6, %v2313_v7 }
 0x206   :  { %v4230_v3 = vadd.f32 %v4186_v24, %v2314_v41  ;;  %v4233_v50 = vadd.f32 %v4191_v5, %v2315_v2  ;;  %v4236_v33 = vadd.f32 %v4196_v1, %v2316_v8  ;;  %v4239_v19 = vadd.f32 %v4201_v6, %v2317_v12 }
 0x207   :  { %v4242_v35 = vadd.f32 %v4186_v24, %v2318_v47  ;;  %v4245_v18 = vadd.f32 %v4191_v5, %v2319_v56  ;;  %v4248_v27 = vadd.f32 %v4196_v1, %v2320_v55  ;;  %v2406_v38 = vmul.f32 1.442695, %v4204_v46 }
 0x208   :  { %v2408_v32 = vmul.f32 1.442695, %v4207_v54  ;;  %v4253_v62 = vadd.f32 %v4201_v6, %v2321_v4  ;;  %v2410_v53 = vmul.f32 1.442695, %v4212_v51  ;;  %v2412_v26 = vmul.f32 1.442695, %v4215_v16 }
 0x209   :  { %v4258_v31 = vadd.f32 %v2305_v25, %v4856_v36  ;;  %v4261_v49 = vadd.f32 %v4186_v24, %v2322_v11  ;;  %v4264_v59 = vadd.f32 %v4191_v5, %v2323_v34  ;;  %2930 = vpow2.f32 %v2406_v38 }
 0x20a   :  { %v2414_v20 = vmul.f32 1.442695, %v4218_v52  ;;  %v4268_v7 = vadd.f32 %v4196_v1, %v2324_v40  ;;  %v4271_v41 = vadd.f32 %v4201_v6, %v2325_v17  ;;  %2932 = vpow2.f32 %v2408_v32 }
 0x20b   :  { %v2416_v2 = vmul.f32 1.442695, %v4221_v13  ;;  %v4275_v8 = vadd.f32 %v4186_v24, %v2326_v15  ;;  %v4278_v12 = vadd.f32 %v4191_v5, %v2327_v45  ;;  %2934 = vpow2.f32 %v2410_v53 }
 0x20c   :  { %v2418_v47 = vmul.f32 1.442695, %v4224_v42  ;;  %v4282_v56 = vadd.f32 %v4196_v1, %v2328_v44  ;;  %v4285_v55 = vadd.f32 %v4201_v6, %v2329_v0  ;;  %2936 = vpow2.f32 %v2412_v26 }
 0x20d   :  { %v2420_v4 = vmul.f32 1.442695, %v4227_v23  ;;  %v4289_v11 = vadd.f32 %v4186_v24, %v2330_v30  ;;  %v4292_v34 = vadd.f32 %v4191_v5, %v2331_v39  ;;  %2938 = vpow2.f32 %v2414_v20 }
 0x20e   :  { %v2422_v40 = vmul.f32 1.442695, %v4230_v3  ;;  %v4296_v17 = vadd.f32 %v4196_v1, %v2332_v9  ;;  %vm2374_vm0 = vcmp.gt.f32.partialorder %v4204_v46, 0.0  ;;  %2940 = vpow2.f32 %v2416_v2 }
 0x20f   :  { %v2424_v15 = vmul.f32 1.442695, %v4233_v50  ;;  %vm2375_vm1 = vcmp.gt.f32.partialorder %v4207_v54, 0.0  ;;  %vm2376_vm2 = vcmp.gt.f32.partialorder %v4212_v51, 0.0  ;;  %2942 = vpow2.f32 %v2418_v47 }
 0x210   :  { %v2426_v29 = vmul.f32 1.442695, %v4236_v33  ;;  %vm2377_vm3 = vcmp.gt.f32.partialorder %v4215_v16, 0.0  ;;  %2944 = vpow2.f32 %v2420_v4  ;;  %v2428_v45 = vmul.f32 1.442695, %v4239_v19  ;;  %v4343_v4 = vld [vmem:[#allocation6] sm:$0xff] }
 0x211   :  { %v2430_v43 = vmul.f32 1.442695, %v4242_v35  ;;  %v2432_v44 = vmul.f32 1.442695, %v4245_v18  ;;  %vm2378_vm4 = vcmp.gt.f32.partialorder %v4218_v52, 0.0  ;;  %2946 = vpow2.f32 %v2422_v40 }
 0x212   :  { %v2434_v37 = vmul.f32 1.442695, %v4248_v27  ;;  %v2436_v0 = vmul.f32 1.442695, %v4253_v62  ;;  %v2438_v57 = vmul.f32 1.442695, %v4261_v49  ;;  %2948 = vpow2.f32 %v2424_v15 }
 0x213   :  { %vm2379_vm5 = vcmp.gt.f32.partialorder %v4221_v13, 0.0  ;;  %v2440_v30 = vmul.f32 1.442695, %v4264_v59  ;;  %v2442_v58 = vmul.f32 1.442695, %v4268_v7  ;;  %v2931_v14 = vpop.eup %2930  ;;  %vm2380_vm6 = vcmp.gt.f32.partialorder %v4224_v42, 0.0 }
 0x214   :  { %v2444_v39 = vmul.f32 1.442695, %v4271_v41  ;;  %2950 = vpow2.f32 %v2426_v29  ;;  %v2446_v9 = vmul.f32 1.442695, %v4275_v8  ;;  %v4318_v60 = vmul.f32 1.442695, %v4278_v12  ;;  %v2933_v48 = vpop.eup %2932 }
 0x215   :  { %v4321_v21 = vmul.f32 1.442695, %v4282_v56  ;;  %vm2381_vm7 = vcmp.gt.f32.partialorder %v4227_v23, 0.0  ;;  %2952 = vpow2.f32 %v2428_v45  ;;  %v4325_v61 = vmul.f32 1.442695, %v4289_v11  ;;  %v2935_v32 = vpop.eup %2934  ;;  %v4353_v15 = vld [vmem:[#allocation6 + $0x8] sm:$0xff] }
 0x216   :  { %v4328_v25 = vmul.f32 1.442695, %v4292_v34  ;;  %v2887_v38 = vadd.f32 -1.0, %v2931_v14  ;;  %vm2382_vm8 = vcmp.gt.f32.partialorder %v4230_v3, 0.0  ;;  %2954 = vpow2.f32 %v2430_v43  ;;  %v2937_v20 = vpop.eup %2936 }
 0x217   :  { %v2888_v53 = vadd.f32 -1.0, %v2933_v48  ;;  %v4333_v26 = vadd.f32 %v4201_v6, %v4172_v63  ;;  %v4337_v36 = vadd.f32 %v4186_v24, %v4175_v22  ;;  %vm2383_vm9 = vcmp.gt.f32.partialorder %v4233_v50, 0.0  ;;  %v2939_v63 = vpop.eup %2938 }
 0x218   :  { %2956 = vpow2.f32 %v2432_v44  ;;  %v2889_v2 = vadd.f32 -1.0, %v2935_v32  ;;  %v2502_v47 = vsel %vm2374_vm0, %v4204_v46, %v2887_v38  ;;  %v4347_v40 = vadd.f32 %v4191_v5, %v4178_v10  ;;  %v2941_v29 = vpop.eup %2940  ;;  %v4362_v5 = vld [vmem:[#allocation6 + $0x10] sm:$0xff] }
 0x219   :  { %vm2384_vm10 = vcmp.gt.f32.partialorder %v4236_v33, 0.0  ;;  %2958 = vpow2.f32 %v2434_v37  ;;  %v2890_v22 = vadd.f32 -1.0, %v2937_v20  ;;  %v2503_v24 = vsel %vm2375_vm1, %v4207_v54, %v2888_v53  ;;  %v2943_v54 = vpop.eup %2942 }
 0x21a   :  { %v4357_v46 = vadd.f32 %v4196_v1, %v4181_v28  ;;  %2960 = vpow2.f32 %v2436_v0  ;;  %v2891_v45 = vadd.f32 -1.0, %v2939_v63  ;;  %v2504_v10 = vsel %vm2376_vm2, %v4212_v51, %v2889_v2  ;;  %v4372_v1 = vld [vmem:[#allocation6 + $0x18] sm:$0xff]  ;;  %v2945_v51 = vpop.eup %2944 }
 0x21b   :  { %v4366_v43 = vadd.f32 %v4201_v6, %v4258_v31  ;;  %vm2385_vm11 = vcmp.gt.f32.partialorder %v4239_v19, 0.0  ;;  %2962 = vpow2.f32 %v2438_v57  ;;  %v2892_v44 = vadd.f32 -1.0, %v2941_v29  ;;  %v2947_v57 = vpop.eup %2946 }
 0x21c   :  { %v2505_v28 = vsel %vm2377_vm3, %v4215_v16, %v2890_v22  ;;  %v2538_v37 = vmul.f32 %v4343_v4, %v2502_v47  ;;  %vm2386_vm12 = vcmp.gt.f32.partialorder %v4242_v35, 0.0  ;;  %2964 = vpow2.f32 %v2440_v30  ;;  %v2949_v38 = vpop.eup %2948 }
 0x21d   :  { %v2893_v0 = vadd.f32 -1.0, %v2943_v54  ;;  %v2506_v6 = vsel %vm2378_vm4, %v4218_v52, %v2891_v45  ;;  %v2539_v31 = vmul.f32 %v4353_v15, %v2503_v24  ;;  %vm2387_vm13 = vcmp.gt.f32.partialorder %v4245_v18, 0.0 }
 0x21e   :  { %2966 = vpow2.f32 %v2442_v58  ;;  %v2894_v16 = vadd.f32 -1.0, %v2945_v51  ;;  %v2507_v14 = vsel %vm2379_vm5, %v4221_v13, %v2892_v44  ;;  %v2540_v48 = vmul.f32 %v4362_v5, %v2504_v10  ;;  %v2951_v53 = vpop.eup %2950 }
 0x21f   :  { %2968 = vpow2.f32 %v2444_v39  ;;  %v2895_v30 = vadd.f32 -1.0, %v2947_v57  ;;  %v2508_v52 = vsel %vm2380_vm6, %v4224_v42, %v2893_v0  ;;  %v4389_v32 = vmul.f32 %v4372_v1, %v2505_v28  ;;  %v2953_v2 = vpop.eup %2952 }
 0x220   :  { %2970 = vpow2.f32 %v2446_v9  ;;  %v2896_v58 = vadd.f32 -1.0, %v2949_v38  ;;  %v2509_v20 = vsel %vm2381_vm7, %v4227_v23, %v2894_v16  ;;  %v2542_v13 = vmul.f32 %v4343_v4, %v2506_v6  ;;  %v2955_v9 = vpop.eup %2954 }
 0x221   :  { %vm2390_vm14 = vcmp.gt.f32.partialorder %v4261_v49, 0.0  ;;  %2972 = vpow2.f32 %v4318_v60  ;;  %v2897_v39 = vadd.f32 -1.0, %v2951_v53  ;;  %v2510_v42 = vsel %vm2382_vm8, %v4230_v3, %v2895_v30 }
 0x222   :  { %v2543_v47 = vmul.f32 %v4353_v15, %v2507_v14  ;;  %vm2388_vm15 = vcmp.gt.f32.partialorder %v4248_v27, 0.0  ;;  %vm2391_vm0 = vcmp.gt.f32.partialorder %v4264_v59, 0.0  ;;  %2974 = vpow2.f32 %v4321_v21  ;;  %v2957_v22 = vpop.eup %2956 }
 0x223   :  { %v2898_v23 = vadd.f32 -1.0, %v2953_v2  ;;  %v2511_v63 = vsel %vm2383_vm9, %v4233_v50, %v2896_v58  ;;  %v4408_v60 = vmul.f32 %v4362_v5, %v2508_v52  ;;  %vm2392_vm1 = vcmp.gt.f32.partialorder %v4268_v7, 0.0  ;;  %v2959_v29 = vpop.eup %2958 }
 0x224   :  { %2976 = vpow2.f32 %v4325_v61  ;;  %v2899_v3 = vadd.f32 -1.0, %v2955_v9  ;;  %v2512_v24 = vsel %vm2384_vm10, %v4236_v33, %v2897_v39  ;;  %v4416_v21 = vmul.f32 %v4372_v1, %v2509_v20  ;;  %v2961_v33 = vpop.eup %2960 }
 0x225   :  { %vm2389_vm2 = vcmp.gt.f32.partialorder %v4253_v62, 0.0  ;;  %2978 = vpow2.f32 %v4328_v25  ;;  %v2900_v50 = vadd.f32 -1.0, %v2957_v22  ;;  %v4421_v45 = vmul.f32 %v4343_v4, %v2510_v42  ;;  %v2963_v28 = vpop.eup %2962 }
 0x226   :  { %v4424_v10 = vmul.f32 %v4353_v15, %v2511_v63  ;;  %vm2393_vm3 = vcmp.gt.f32.partialorder %v4271_v41, 0.0  ;;  %vm2394_vm4 = vcmp.gt.f32.partialorder %v4275_v8, 0.0  ;;  %v2513_v61 = vsel %vm2385_vm11, %v4239_v19, %v2898_v23  ;;  %v2965_v57 = vpop.eup %2964 }
 0x227   :  { %v4432_v54 = vmul.f32 %v4362_v5, %v2512_v24  ;;  %v2570_v25 = vadd.f32 %v2539_v31, %v2538_v37  ;;  %v4434_v44 = vadd.f32 %v2543_v47, %v2542_v13  ;;  %vm2395_vm5 = vcmp.gt.f32.partialorder %v4278_v12, 0.0 }
 0x228   :  { %v2514_v51 = vsel %vm2386_vm12, %v4242_v35, %v2899_v3  ;;  %vm2396_vm6 = vcmp.gt.f32.partialorder %v4282_v56, 0.0  ;;  %v2452_v0 = vmul.f32 1.442695, %v4285_v55  ;;  %v2458_v6 = vmul.f32 1.442695, %v4296_v17  ;;  %v2967_v14 = vpop.eup %2966 }
 0x229   :  { %v2460_v19 = vmul.f32 1.442695, %v4333_v26  ;;  %v2903_v16 = vadd.f32 -1.0, %v2963_v28  ;;  %v2515_v37 = vsel %vm2387_vm13, %v4245_v18, %v2900_v50  ;;  %v4447_v31 = vadd.f32 %v2570_v25, %v2540_v48  ;;  %v2969_v53 = vpop.eup %2968 }
 0x22a   :  { %vm2398_vm7 = vcmp.gt.f32.partialorder %v4289_v11, 0.0  ;;  %v2462_v35 = vmul.f32 1.442695, %v4337_v36  ;;  %v2904_v38 = vadd.f32 -1.0, %v2965_v57  ;;  %vm2399_vm8 = vcmp.gt.f32.partialorder %v4292_v34, 0.0  ;;  %v2971_v20 = vpop.eup %2970 }
 0x22b   :  { %2980 = vpow2.f32 %v2452_v0  ;;  %v2464_v30 = vmul.f32 1.442695, %v4347_v40  ;;  %v2466_v52 = vmul.f32 1.442695, %v4357_v46  ;;  %v2468_v58 = vmul.f32 1.442695, %v4366_v43  ;;  %v2973_v42 = vpop.eup %2972 }
 0x22c   :  { %2982 = vpow2.f32 %v2458_v6  ;;  %v2901_v18 = vadd.f32 -1.0, %v2959_v29  ;;  %v2902_v48 = vadd.f32 -1.0, %v2961_v33  ;;  %v2518_v13 = vsel %vm2390_vm14, %v4261_v49, %v2903_v16  ;;  %v2975_v63 = vpop.eup %2974 }
 0x22d   :  { %2984 = vpow2.f32 %v2460_v19  ;;  %v2905_v2 = vadd.f32 -1.0, %v2967_v14  ;;  %v2906_v39 = vadd.f32 -1.0, %v2969_v53  ;;  %v2519_v47 = vsel %vm2391_vm0, %v4264_v59, %v2904_v38 }
 0x22e   :  { %2986 = vpow2.f32 %v2462_v35  ;;  %v2907_v9 = vadd.f32 -1.0, %v2971_v20  ;;  %v2516_v23 = vsel %vm2388_vm15, %v4248_v27, %v2901_v18  ;;  %vm2397_vm9 = vcmp.gt.f32.partialorder %v4285_v55, 0.0  ;;  %v2977_v59 = vpop.eup %2976 }
 0x22f   :  { %2988 = vpow2.f32 %v2464_v30  ;;  %v2908_v22 = vadd.f32 -1.0, %v2973_v42  ;;  %v2517_v49 = vsel %vm2389_vm2, %v4253_v62, %v2902_v48  ;;  %v2520_v3 = vsel %vm2392_vm1, %v4268_v7, %v2905_v2  ;;  %v2979_v50 = vpop.eup %2978 }
 0x230   :  { %vm2400_vm10 = vcmp.gt.f32.partialorder %v4296_v17, 0.0  ;;  %2990 = vpow2.f32 %v2466_v52  ;;  %v2909_v24 = vadd.f32 -1.0, %v2975_v63  ;;  %v2521_v27 = vsel %vm2393_vm3, %v4271_v41, %v2906_v39 }
 0x231   :  { %v2522_v29 = vsel %vm2394_vm4, %v4275_v8, %v2907_v9  ;;  %vm2401_vm11 = vcmp.gt.f32.partialorder %v4333_v26, 0.0  ;;  %2992 = vpow2.f32 %v2468_v58  ;;  %v2911_v62 = vadd.f32 -1.0, %v2977_v59 }
 0x232   :  { %v2523_v7 = vsel %vm2395_vm5, %v4278_v12, %v2908_v22  ;;  %v2549_v33 = vmul.f32 %v4372_v1, %v2513_v61  ;;  %vm2402_vm12 = vcmp.gt.f32.partialorder %v4337_v36, 0.0  ;;  %v2912_v25 = vadd.f32 -1.0, %v2979_v50 }
 0x233   :  { %v2524_v41 = vsel %vm2396_vm6, %v4282_v56, %v2909_v24  ;;  %v2550_v8 = vmul.f32 %v4343_v4, %v2514_v51  ;;  %v2551_v28 = vmul.f32 %v4353_v15, %v2515_v37  ;;  %vm2403_vm13 = vcmp.gt.f32.partialorder %v4347_v40, 0.0 }
 0x234   :  { %v2526_v0 = vsel %vm2398_vm7, %v4289_v11, %v2911_v62  ;;  %v2552_v12 = vmul.f32 %v4362_v5, %v2516_v23  ;;  %v2554_v61 = vmul.f32 %v4343_v4, %v2518_v13  ;;  %v2555_v6 = vmul.f32 %v4353_v15, %v2519_v47 }
 0x235   :  { %vm2404_vm14 = vcmp.gt.f32.partialorder %v4357_v46, 0.0  ;;  %v2527_v56 = vsel %vm2399_vm8, %v4292_v34, %v2912_v25  ;;  %v2553_v51 = vmul.f32 %v4372_v1, %v2517_v49  ;;  %v2556_v19 = vmul.f32 %v4362_v5, %v2520_v3  ;;  %v2981_v16 = vpop.eup %2980 }
 0x236   :  { %v2558_v57 = vmul.f32 %v4343_v4, %v2522_v29  ;;  %vm2405_vm15 = vcmp.gt.f32.partialorder %v4366_v43, 0.0  ;;  %v2557_v11 = vmul.f32 %v4372_v1, %v2521_v27  ;;  %v2559_v37 = vmul.f32 %v4353_v15, %v2523_v7  ;;  %v2983_v38 = vpop.eup %2982 }
 0x237   :  { %v2560_v35 = vmul.f32 %v4362_v5, %v2524_v41  ;;  %v2562_v14 = vmul.f32 %v4343_v4, %v2526_v0  ;;  %v2910_v30 = vadd.f32 -1.0, %v2981_v16  ;;  %v2572_v34 = vadd.f32 %v4447_v31, %v4389_v32  ;;  %v2985_v58 = vpop.eup %2984 }
 0x238   :  { %v2580_v52 = vadd.f32 %v4434_v44, %v4408_v60  ;;  %v2588_v53 = vadd.f32 %v4424_v10, %v4421_v45  ;;  %v2913_v18 = vadd.f32 -1.0, %v2983_v38  ;;  %v2597_v48 = vadd.f32 %v2551_v28, %v2550_v8  ;;  %v2987_v2 = vpop.eup %2986 }
 0x239   :  { %v2606_v20 = vadd.f32 %v2555_v6, %v2554_v61  ;;  %v2615_v13 = vadd.f32 %v2559_v37, %v2558_v57  ;;  %v2914_v39 = vadd.f32 -1.0, %v2985_v58  ;;  %v2525_v42 = vsel %vm2397_vm9, %v4285_v55, %v2910_v30  ;;  %v2989_v31 = vpop.eup %2988 }
 0x23a   :  { %v2573_v47 = vrot.slane %v2572_v34, 4  ;;  %v2581_v32 = vadd.f32 %v2580_v52, %v4416_v21  ;;  %v2915_v9 = vadd.f32 -1.0, %v2987_v2  ;;  %v2528_v60 = vsel %vm2400_vm10, %v4296_v17, %v2913_v18  ;;  %v2991_v44 = vpop.eup %2990 }
 0x23b   :  { %v2563_v45 = vmul.f32 %v4353_v15, %v2527_v56  ;;  %v2589_v10 = vadd.f32 %v2588_v53, %v4432_v54  ;;  %v2916_v23 = vadd.f32 -1.0, %v2989_v31  ;;  %v2529_v63 = vsel %vm2401_vm11, %v4333_v26, %v2914_v39  ;;  %v2993_v21 = vpop.eup %2992 }
 0x23c   :  { %v2561_v55 = vmul.f32 %v4372_v1, %v2525_v42  ;;  %v2574_v22 = vadd.f32 %v2573_v47, %v2572_v34  ;;  %v2917_v49 = vadd.f32 -1.0, %v2991_v44  ;;  %v2530_v3 = vsel %vm2402_vm12, %v4337_v36, %v2915_v9 }
 0x23d   :  { %v2564_v17 = vmul.f32 %v4362_v5, %v2528_v60  ;;  %v2582_v59 = vrot.slane %v2581_v32, 4  ;;  %v2918_v24 = vadd.f32 -1.0, %v2993_v21  ;;  %v2531_v54 = vsel %vm2403_vm13, %v4347_v40, %v2916_v23 }
 0x23e   :  { %v2566_v27 = vmul.f32 %v4343_v4, %v2530_v3  ;;  %v2575_v26 = vrot.slane %v2574_v22, 2  ;;  %v2532_v29 = vsel %vm2404_vm14, %v4357_v46, %v2917_v49  ;;  %v2567_v50 = vmul.f32 %v4353_v15, %v2531_v54 }
 0x23f   :  { %v2583_v62 = vadd.f32 %v2582_v59, %v2581_v32  ;;  %v2590_v7 = vadd.f32 %v2589_v10, %v2549_v33  ;;  %v2533_v36 = vsel %vm2405_vm15, %v4366_v43, %v2918_v24  ;;  %v2565_v25 = vmul.f32 %v4372_v1, %v2529_v63 }
 0x240   :  { %v2576_v41 = vadd.f32 %v2575_v26, %v2574_v22  ;;  %v2598_v8 = vadd.f32 %v2597_v48, %v2552_v12  ;;  %v2568_v40 = vmul.f32 %v4362_v5, %v2532_v29  ;;  %v2607_v0 = vadd.f32 %v2606_v20, %v2556_v19 }
 0x241   :  { %v2584_v4 = vrot.slane %v2583_v62, 2  ;;  %v2591_v28 = vrot.slane %v2590_v7, 4  ;;  %v2616_v46 = vadd.f32 %v2615_v13, %v2560_v35  ;;  %v2624_v56 = vadd.f32 %v2563_v45, %v2562_v14 }
 0x242   :  { %v2577_v61 = vrot.slane %v2576_v41, 1  ;;  %v2599_v6 = vadd.f32 %v2598_v8, %v2553_v51  ;;  %v2608_v33 = vadd.f32 %v2607_v0, %v2557_v11  ;;  %v2633_v16 = vadd.f32 %v2567_v50, %v2566_v27  ;;  %v2919_v11 = vld [vmem:[%s4581_s6] ss:$0 sm:$0xff] }
 0x243   :  { %v2585_v15 = vadd.f32 %v2584_v4, %v2583_v62  ;;  %v2592_v57 = vadd.f32 %v2591_v28, %v2590_v7  ;;  %v2569_v37 = vmul.f32 %v4372_v1, %v2533_v36  ;;  %v2617_v38 = vadd.f32 %v2616_v46, %v2561_v55 }
 0x244   :  { %v2600_v43 = vrot.slane %v2599_v6, 4  ;;  %v2625_v30 = vadd.f32 %v2624_v56, %v2564_v17  ;;  %v2609_v52 = vrot.slane %v2608_v33, 4  ;;  %v2634_v5 = vadd.f32 %v2633_v16, %v2568_v40 }
 0x245   :  { %v2586_v34 = vrot.slane %v2585_v15, 1  ;;  %v2593_v12 = vrot.slane %v2592_v57, 2  ;;  %v2578_v53 = vadd.f32 %v2577_v61, %v2576_v41  ;;  %v2618_v19 = vrot.slane %v2617_v38, 4 }
 0x246   :  { %v2601_v58 = vadd.f32 %v2600_v43, %v2599_v6  ;;  %v2626_v18 = vadd.f32 %v2625_v30, %v2565_v25  ;;  %v2610_v14 = vadd.f32 %v2609_v52, %v2608_v33  ;;  %v2635_v48 = vadd.f32 %v2634_v5, %v2569_v37 }
 0x247   :  { %v2587_v51 = vadd.f32 %v2586_v34, %v2585_v15  ;;  %v2594_v35 = vadd.f32 %v2593_v12, %v2592_v57  ;;  %v2619_v20 = vadd.f32 %v2618_v19, %v2617_v38  ;;  %v4550_v60 = vadd.f32 %v2919_v11, %v2578_v53 }
 0x248   :  { %v2602_v1 = vrot.slane %v2601_v58, 2  ;;  %v2627_v13 = vrot.slane %v2626_v18, 4  ;;  %v2611_v39 = vrot.slane %v2610_v14, 2  ;;  %v2636_v42 = vrot.slane %v2635_v48, 4 }
 0x249   :  { %v2595_v2 = vrot.slane %v2594_v35, 1  ;;  %v4548_v47 = vadd.f32 %v2919_v11, %v2587_v51  ;;  %v2620_v31 = vrot.slane %v2619_v20, 2  ;;  %vm2674_vm0 = vcmask 1041409  }
 0x24a   :  { %v2603_v32 = vadd.f32 %v2602_v1, %v2601_v58  ;;  %v2628_v9 = vadd.f32 %v2627_v13, %v2626_v18  ;;  %v2612_v10 = vadd.f32 %v2611_v39, %v2610_v14  ;;  %v2637_v44 = vadd.f32 %v2636_v42, %v2635_v48 }
 0x24b   :  { %v2596_v45 = vadd.f32 %v2595_v2, %v2594_v35  ;;  %v2658_v23 = vmul.f32 %v4548_v47, %v4548_v47  ;;  %v2621_v55 = vadd.f32 %v2620_v31, %v2619_v20  ;;  %v2657_v27 = vmul.f32 %v4550_v60, %v4550_v60 }
 0x24c   :  { %v2604_v63 = vrot.slane %v2603_v32, 1  ;;  %v2629_v22 = vrot.slane %v2628_v9, 2  ;;  %v2613_v21 = vrot.slane %v2612_v10, 1  ;;  %v2638_v49 = vrot.slane %v2637_v44, 2 }
 0x24d   :  { %v2651_v3 = vadd.f32 %v2919_v11, %v2596_v45  ;;  %v2673_v17 = vrot.slane %v2658_v23, 7  ;;  %v2622_v24 = vrot.slane %v2621_v55, 1  ;;  %vm2677_vm1 = vcmask 1042434  }
 0x24e   :  { %v2605_v59 = vadd.f32 %v2604_v63, %v2603_v32  ;;  %v2630_v54 = vadd.f32 %v2629_v22, %v2628_v9  ;;  %v2614_v26 = vadd.f32 %v2613_v21, %v2612_v10  ;;  %v2639_v29 = vadd.f32 %v2638_v49, %v2637_v44 }
 0x24f   :  { %v2659_v50 = vmul.f32 %v2651_v3, %v2651_v3  ;;  %v2623_v62 = vadd.f32 %v2622_v24, %v2621_v55  ;;  %v2675_v25 = vsel %vm2674_vm0, %v2673_v17, %v2657_v27  ;;  %vm2680_vm2 = vcmask 1043459  }
 0x250   :  { %v2631_v7 = vrot.slane %v2630_v54, 1  ;;  %v2652_v36 = vadd.f32 %v2919_v11, %v2605_v59  ;;  %v2640_v41 = vrot.slane %v2639_v29, 1  ;;  %v2653_v8 = vadd.f32 %v2919_v11, %v2614_v26 }
 0x251   :  { %v2676_v40 = vrot.slane %v2659_v50, 6  ;;  %v2654_v28 = vadd.f32 %v2919_v11, %v2623_v62  ;;  %vm2683_vm3 = vcmask 1044484   ;;  %vm2686_vm4 = vcmask 1045509  }
 0x252   :  { %v2632_v4 = vadd.f32 %v2631_v7, %v2630_v54  ;;  %v2660_v0 = vmul.f32 %v2652_v36, %v2652_v36  ;;  %v2641_v61 = vadd.f32 %v2640_v41, %v2639_v29  ;;  %v2661_v6 = vmul.f32 %v2653_v8, %v2653_v8 }
 0x253   :  { %v2678_v46 = vsel %vm2677_vm1, %v2676_v40, %v2675_v25  ;;  %v2662_v15 = vmul.f32 %v2654_v28, %v2654_v28  ;;  %vm2689_vm5 = vcmask 1046534   ;;  %vm2692_vm6 = vcmask 1047559  }
 0x254   :  { %v2655_v56 = vadd.f32 %v2919_v11, %v2632_v4  ;;  %v2679_v57 = vrot.slane %v2660_v0, 5  ;;  %v2656_v33 = vadd.f32 %v2919_v11, %v2641_v61  ;;  %v2682_v16 = vrot.slane %v2661_v6, 4 }
 0x255   :  { %v2685_v38 = vrot.slane %v2662_v15, 3 }
 0x256   :  { %v2663_v37 = vmul.f32 %v2655_v56, %v2655_v56  ;;  %v2681_v43 = vsel %vm2680_vm2, %v2679_v57, %v2678_v46  ;;  %v2664_v30 = vmul.f32 %v2656_v33, %v2656_v33 }
 0x257   :  { %v2684_v34 = vsel %vm2683_vm3, %v2682_v16, %v2681_v43 }
 0x258   :  { %v2687_v12 = vsel %vm2686_vm4, %v2685_v38, %v2684_v34  ;;  %v2688_v52 = vrot.slane %v2663_v37, 2  ;;  %v2691_v5 = vrot.slane %v2664_v30, 1 }
 0x25a   :  { %v2690_v53 = vsel %vm2689_vm5, %v2688_v52, %v2687_v12 }
 0x25b   :  { %v2693_v58 = vsel %vm2692_vm6, %v2691_v5, %v2690_v53 }
 0x25c   :  { %2695 = vadd.xlane.f32.xlu0 %v2693_v58 }
 0x2e9   :  { %v2696_v19 = vpop.xlane.xlu0 %2695 }
 0x2ea   :  { %v2697_v18 = vmax.f32 %v2696_v19, 1e-24 }
 0x2ec   :  { %2994 = vrsqrt.f32 %v2697_v18 }
 0x2f6   :  { %v2995_v51 = vpop.eup %2994 }
 0x2f7   :  { %v2700_v35 = vrot.slane %v2995_v51, 1  ;;  %v2701_v14 = vrot.slane %v2995_v51, 2  ;;  %v2702_v48 = vrot.slane %v2995_v51, 3  ;;  %v2703_v11 = vrot.slane %v2995_v51, 4 }
 0x2f8   :  { %v2704_v1 = vrot.slane %v2995_v51, 5  ;;  %v2705_v20 = vrot.slane %v2995_v51, 6  ;;  %v2706_v13 = vrot.slane %v2995_v51, 7  ;;  %v2715_v31 = vmul.f32 %v2995_v51, %v4550_v60 }
 0x2f9   :  { %v2716_v2 = vmul.f32 %v2700_v35, %v4548_v47  ;;  %v2717_v39 = vmul.f32 %v2701_v14, %v2651_v3  ;;  %v2718_v42 = vmul.f32 %v2702_v48, %v2652_v36  ;;  %v2719_v32 = vmul.f32 %v2703_v11, %v2653_v8 }
 0x2fa   :  { %v2720_v9 = vmul.f32 %v2704_v1, %v2654_v28  ;;  %v2721_v44 = vmul.f32 %v2705_v20, %v2655_v56  ;;  %v2722_v23 = vmul.f32 %v2706_v13, %v2656_v33 }
 0x2fb   :  { %v2731_v45 = vrot.slane %v2716_v2, 7  ;;  %v2733_v10 = vrot.slane %v2717_v39, 6  ;;  %v2735_v55 = vrot.slane %v2718_v42, 5  ;;  %v2737_v21 = vrot.slane %v2719_v32, 4 }
 0x2fc   :  { %v2739_v17 = vrot.slane %v2720_v9, 3  ;;  %v2741_v3 = vrot.slane %v2721_v44, 2  ;;  %v2743_v60 = vrot.slane %v2722_v23, 1 }
 0x2fd   :  { %v2732_v63 = vsel %vm2674_vm0, %v2731_v45, %v2715_v31 }
 0x2fe   :  { %v2734_v22 = vsel %vm2677_vm1, %v2733_v10, %v2732_v63 }
 0x2ff   :  { %v2736_v49 = vsel %vm2680_vm2, %v2735_v55, %v2734_v22 }
 0x300   :  { %v2738_v47 = vsel %vm2683_vm3, %v2737_v21, %v2736_v49 }
 0x301   :  { %v2740_v59 = vsel %vm2686_vm4, %v2739_v17, %v2738_v47 }
 0x302   :  { %v2742_v24 = vsel %vm2689_vm5, %v2741_v3, %v2740_v59 }
 0x303   :  { %v2744_v54 = vsel %vm2692_vm6, %v2743_v60, %v2742_v24 }
 0x304   :  { %2746 = vst [vmem:[%s4583_s8] sm:$0xff] %v2744_v54 }
 0x305   :  { %2755 = vsyncpa [#allocation3], 1 }
 0x306   :  { %2756 = vsyncpa [#allocation5], 1 }

</bundles_post_ra>
